<compile_context>
chip_gen: v7x
topology: tpu7x:2x2x1
jax: 0.10.0
libtpu: 0.0.40
codegen_flags: <defaults>
</compile_context>

<pallas_src>
import math
import functools

import jax
import jax.numpy as jnp
from jax import lax
from jax.experimental import pallas as pl
from jax.experimental.pallas import tpu as pltpu

# ---------------- config (consistent with the module) ----------------
VOCAB_SIZE = 65
VOCAB_PAD = 128          # lane-dense lm_head output, sliced back to 65 in glue
BLOCK_SIZE = 64
N_LAYER = 2
N_HEAD = 4
N_EMBD = 32              # head_dim = 8
HEAD_DIM = N_EMBD // N_HEAD
B = 2
T = 8                    # runtime sequence length (<= BLOCK_SIZE)


# ---------------------------- shared math helpers ----------------------------
def _layernorm(x, w, b, eps=1e-5):
    mu = jnp.mean(x, axis=-1, keepdims=True)
    var = jnp.mean((x - mu) ** 2, axis=-1, keepdims=True)
    return (x - mu) * lax.rsqrt(var + eps) * w + b


def _new_gelu(x):
    return 0.5 * x * (1.0 + jnp.tanh(math.sqrt(2.0 / math.pi)
                                     * (x + 0.044715 * x * x * x)))


# ---------------------------- fused GPT kernel --------------------------------
def gpt_kernel(idx_ref,                      # SMEM (B*T,) int32
               wte_ref, wpe_ref,             # VMEM f32 (V,C) / (block,C)
               ln1w_ref, ln1b_ref,           # (L,1,C) f32
               wqkv_ref, bqkv_ref,           # (L,C,3C) bf16 / (L,1,3C) f32
               wproj_ref, bproj_ref,         # (L,C,C) bf16 / (L,1,C) f32
               ln2w_ref, ln2b_ref,           # (L,1,C) f32
               wfc_ref, bfc_ref,             # (L,C,4C) bf16 / (L,1,4C) f32
               wp2_ref, bp2_ref,             # (L,4C,C) bf16 / (L,1,C) f32
               lnfw_ref, lnfb_ref,           # (1,C) f32
               wteT_ref,                     # (C, VOCAB_PAD) bf16 (tied, padded)
               o_ref,                        # (B*T, VOCAB_PAD) f32
               xbuf_ref,                     # scratch VMEM (B*T, C) f32
               *, seq_len, n_head):
    bt, c = xbuf_ref.shape
    n_layer = ln1w_ref.shape[0]
    hd = c // n_head
    scale = 1.0 / math.sqrt(hd)
    bf16 = jnp.bfloat16
    f32 = jnp.float32

    # ---- token + position embedding gather (idx lives in SMEM) ----
    for i in range(bt):
        tok = wte_ref[pl.ds(idx_ref[i], 1), :]              # (1, C) dynamic row
        xbuf_ref[pl.ds(i, 1), :] = tok + wpe_ref[pl.ds(i % seq_len, 1), :]
    x = xbuf_ref[...]                                        # (B*T, C) f32
    # dropout(p=0.0) is an identity -> omitted

    # ---- block-diagonal causal mask, built once, reused by all layers ----
    rows = lax.broadcasted_iota(jnp.int32, (bt, bt), 0)
    cols = lax.broadcasted_iota(jnp.int32, (bt, bt), 1)
    if seq_len & (seq_len - 1) == 0:                         # power-of-two fast path
        shift = seq_len.bit_length() - 1
        same = lax.shift_right_logical(rows, shift) == lax.shift_right_logical(cols, shift)
    else:
        same = (rows // seq_len) == (cols // seq_len)
    keep = jnp.logical_and(same, cols <= rows)
    # kept positions: scores * 1/sqrt(hd); causal-masked: exactly -20 (reference);
    # cross-sequence (from batch folding): -1e30 -> exp() == 0.
    keep_scale = jnp.where(keep, scale, 0.0).astype(f32)
    fill = jnp.where(keep, 0.0, jnp.where(same, -20.0, -1e30)).astype(f32)
    keep_scale = jnp.concatenate([keep_scale] * n_head, axis=0)   # (H*BT, BT)
    fill = jnp.concatenate([fill] * n_head, axis=0)               # (H*BT, BT)

    for l in range(n_layer):
        # -------- causal self-attention (pre-LN) --------
        h = _layernorm(x, ln1w_ref[l], ln1b_ref[l]).astype(bf16)
        # fused QKV: one lane-dense (16,32)@(32,96) MXU dot per layer
        qkv = jnp.dot(h, wqkv_ref[l], preferred_element_type=f32) + bqkv_ref[l]
        qkv_b = qkv.astype(bf16)

        # per-head scores, stacked along sublanes -> one softmax per layer
        att_parts = []
        for hh in range(n_head):
            qh = qkv_b[:, hh * hd:(hh + 1) * hd]
            kh = qkv_b[:, c + hh * hd: c + (hh + 1) * hd]
            att_parts.append(
                lax.dot_general(qh, kh, (((1,), (1,)), ((), ())),
                                preferred_element_type=f32))      # (BT, BT)
        att = jnp.concatenate(att_parts, axis=0)                  # (H*BT, BT)
        att = att * keep_scale + fill
        m = jnp.max(att, axis=-1, keepdims=True)
        e = jnp.exp(att - m)
        p = e * pl.reciprocal(jnp.sum(e, axis=-1, keepdims=True), approx=True)
        p_b = p.astype(bf16)

        # per-head att @ v, lane-concat back to (BT, C), one fused c_proj dot
        hv_parts = []
        for hh in range(n_head):
            p_h = p_b[hh * bt:(hh + 1) * bt, :]
            vh = qkv_b[:, 2 * c + hh * hd: 2 * c + (hh + 1) * hd]
            hv_parts.append(jnp.dot(p_h, vh, preferred_element_type=f32))
        y = jnp.concatenate(hv_parts, axis=-1).astype(bf16)       # (BT, C)
        y = jnp.dot(y, wproj_ref[l], preferred_element_type=f32) + bproj_ref[l]
        x = x + y

        # -------- MLP (pre-LN) --------
        h2 = _layernorm(x, ln2w_ref[l], ln2b_ref[l]).astype(bf16)
        ff = jnp.dot(h2, wfc_ref[l], preferred_element_type=f32) + bfc_ref[l]
        ff = _new_gelu(ff).astype(bf16)
        ff = jnp.dot(ff, wp2_ref[l], preferred_element_type=f32) + bp2_ref[l]
        x = x + ff

    # -------- final LN + tied lm_head (lane-padded to 128) --------
    hf = _layernorm(x, lnfw_ref[...], lnfb_ref[...]).astype(bf16)
    o_ref[...] = jnp.dot(hf, wteT_ref[...], preferred_element_type=f32)


# ---------------------------- parameter construction --------------------------
def init_params(key):
    """f32 master weights in math layout (y = x @ W + b)."""
    c = N_EMBD
    std = 0.02
    proj_std = 0.02 / math.sqrt(2 * N_LAYER)
    keys = iter(jax.random.split(key, 2 + 4 * N_LAYER))

    wte = std * jax.random.normal(next(keys), (VOCAB_SIZE, c), jnp.float32)
    wpe = std * jax.random.normal(next(keys), (BLOCK_SIZE, c), jnp.float32)

    layers = []
    for _ in range(N_LAYER):
        layers.append(dict(
            ln1w=jnp.ones((c,), jnp.float32), ln1b=jnp.zeros((c,), jnp.float32),
            w_attn=std * jax.random.normal(next(keys), (c, 3 * c), jnp.float32),
            b_attn=jnp.zeros((3 * c,), jnp.float32),
            w_proj=proj_std * jax.random.normal(next(keys), (c, c), jnp.float32),
            b_proj=jnp.zeros((c,), jnp.float32),
            ln2w=jnp.ones((c,), jnp.float32), ln2b=jnp.zeros((c,), jnp.float32),
            w_fc=std * jax.random.normal(next(keys), (c, 4 * c), jnp.float32),
            b_fc=jnp.zeros((4 * c,), jnp.float32),
            w_mlp_proj=proj_std * jax.random.normal(next(keys), (4 * c, c), jnp.float32),
            b_mlp_proj=jnp.zeros((c,), jnp.float32),
        ))
    return dict(wte=wte, wpe=wpe, layers=layers,
                lnfw=jnp.ones((c,), jnp.float32), lnfb=jnp.zeros((c,), jnp.float32))


def pack_params(p):
    """Kernel operand layout: stacked per-layer slabs, bf16 MXU weights, padded head."""
    c = N_EMBD
    L = p["layers"]
    bf16 = jnp.bfloat16
    ln1w = jnp.stack([l["ln1w"].reshape(1, c) for l in L])
    ln1b = jnp.stack([l["ln1b"].reshape(1, c) for l in L])
    wqkv = jnp.stack([l["w_attn"] for l in L]).astype(bf16)            # (L,C,3C)
    bqkv = jnp.stack([l["b_attn"].reshape(1, 3 * c) for l in L])
    wproj = jnp.stack([l["w_proj"] for l in L]).astype(bf16)           # (L,C,C)
    bproj = jnp.stack([l["b_proj"].reshape(1, c) for l in L])
    ln2w = jnp.stack([l["ln2w"].reshape(1, c) for l in L])
    ln2b = jnp.stack([l["ln2b"].reshape(1, c) for l in L])
    wfc = jnp.stack([l["w_fc"] for l in L]).astype(bf16)               # (L,C,4C)
    bfc = jnp.stack([l["b_fc"].reshape(1, 4 * c) for l in L])
    wp2 = jnp.stack([l["w_mlp_proj"] for l in L]).astype(bf16)         # (L,4C,C)
    bp2 = jnp.stack([l["b_mlp_proj"].reshape(1, c) for l in L])
    lnfw = p["lnfw"].reshape(1, c)
    lnfb = p["lnfb"].reshape(1, c)
    # weight tying: lm_head uses wte; pre-transpose and lane-pad 65 -> 128
    wteT = jnp.pad(p["wte"].T, ((0, 0), (0, VOCAB_PAD - VOCAB_SIZE))).astype(bf16)
    return (p["wte"], p["wpe"], ln1w, ln1b, wqkv, bqkv, wproj, bproj,
            ln2w, ln2b, wfc, bfc, wp2, bp2, lnfw, lnfb, wteT)


# ---------------------------- forward (one fused kernel) ----------------------
@jax.jit
def gpt_forward(idx, packed):
    b, t = idx.shape
    assert t <= BLOCK_SIZE
    bt = b * t

    kernel = functools.partial(gpt_kernel, seq_len=t, n_head=N_HEAD)
    smem = pltpu.MemorySpace.SMEM
    vmem = pltpu.MemorySpace.VMEM

    logits_pad = pl.pallas_call(
        kernel,
        out_shape=jax.ShapeDtypeStruct((bt, VOCAB_PAD), jnp.float32),
        in_specs=[pl.BlockSpec(memory_space=smem)]
        + [pl.BlockSpec(memory_space=vmem) for _ in range(len(packed))],
        out_specs=pl.BlockSpec(memory_space=vmem),
        scratch_shapes=[pltpu.VMEM((bt, N_EMBD), jnp.float32)],
    )(idx.reshape(bt).astype(jnp.int32), *packed)

    return logits_pad.reshape(b, t, VOCAB_PAD)[:, :, :VOCAB_SIZE]


# ---------------------------- pure-JAX f32 reference ---------------------------
def ref_forward(idx, p):
    b, t = idx.shape
    c = N_EMBD
    x = p["wte"][idx] + p["wpe"][:t][None, :, :]
    causal = jnp.tril(jnp.ones((t, t), jnp.float32))
    for lp in p["layers"]:
        h = _layernorm(x, lp["ln1w"], lp["ln1b"])
        qkv = h @ lp["w_attn"] + lp["b_attn"]
        q, k, v = jnp.split(qkv, 3, axis=-1)
        q = q.reshape(b, t, N_HEAD, HEAD_DIM).transpose(0, 2, 1, 3)
        k = k.reshape(b, t, N_HEAD, HEAD_DIM).transpose(0, 2, 1, 3)
        v = v.reshape(b, t, N_HEAD, HEAD_DIM).transpose(0, 2, 1, 3)
        att = (q @ jnp.swapaxes(k, -1, -2)) * (1.0 / math.sqrt(HEAD_DIM))
        att = jnp.where(causal[None, None] == 0, -20.0, att)
        att = jax.nn.softmax(att, axis=-1)
        y = (att @ v).transpose(0, 2, 1, 3).reshape(b, t, c)
        y = y @ lp["w_proj"] + lp["b_proj"]
        x = x + y
        h2 = _layernorm(x, lp["ln2w"], lp["ln2b"])
        ff = _new_gelu(h2 @ lp["w_fc"] + lp["b_fc"])
        ff = ff @ lp["w_mlp_proj"] + lp["b_mlp_proj"]
        x = x + ff
    x = _layernorm(x, p["lnfw"], p["lnfb"])
    return x @ p["wte"].T


if __name__ == "__main__":
    key = jax.random.PRNGKey(0)
    pkey, ikey = jax.random.split(key)
    params = init_params(pkey)
    packed = pack_params(params)          # packed once, eagerly
    idx = jax.random.randint(ikey, (B, T), 0, VOCAB_SIZE, dtype=jnp.int32)

    logits = gpt_forward(idx, packed)
    jax.block_until_ready(logits)

    assert logits.shape == (B, T, VOCAB_SIZE), logits.shape
    assert logits.dtype == jnp.float32
    assert bool(jnp.all(jnp.isfinite(logits)))

    # correctness vs pure-JAX f32 reference (kernel uses bf16 MXU operands,
    # so a small numerical deviation is expected)
    ref = ref_forward(idx, params)
    err = float(jnp.max(jnp.abs(logits - ref)))
    assert err < 5e-2, f"max |kernel - ref| = {err}"

    print("KERNEL_OK")
</pallas_src>

<mosaic_0001>
module attributes {stable_mosaic.version = 11 : i64} {
  func.func @gpt_kernel(%arg0: memref<16xi32, #tpu.memory_space<smem>>, %arg1: memref<65x32xf32, #tpu.memory_space<vmem>>, %arg2: memref<64x32xf32, #tpu.memory_space<vmem>>, %arg3: memref<2x1x32xf32, #tpu.memory_space<vmem>>, %arg4: memref<2x1x32xf32, #tpu.memory_space<vmem>>, %arg5: memref<2x32x96xbf16, #tpu.memory_space<vmem>>, %arg6: memref<2x1x96xf32, #tpu.memory_space<vmem>>, %arg7: memref<2x32x32xbf16, #tpu.memory_space<vmem>>, %arg8: memref<2x1x32xf32, #tpu.memory_space<vmem>>, %arg9: memref<2x1x32xf32, #tpu.memory_space<vmem>>, %arg10: memref<2x1x32xf32, #tpu.memory_space<vmem>>, %arg11: memref<2x32x128xbf16, #tpu.memory_space<vmem>>, %arg12: memref<2x1x128xf32, #tpu.memory_space<vmem>>, %arg13: memref<2x128x32xbf16, #tpu.memory_space<vmem>>, %arg14: memref<2x1x32xf32, #tpu.memory_space<vmem>>, %arg15: memref<1x32xf32, #tpu.memory_space<vmem>>, %arg16: memref<1x32xf32, #tpu.memory_space<vmem>>, %arg17: memref<32x128xbf16, #tpu.memory_space<vmem>>, %arg18: memref<16x128xf32, #tpu.memory_space<vmem>>, %arg19: memref<16x32xf32, #tpu.memory_space<vmem>>) attributes {dimension_semantics = [], scalar_prefetch = 0 : i64, scratch_operands = 1 : i64, tpu.core_type = #tpu.core_type<tc>} {
    %c0 = arith.constant 0 : index
    %0 = memref.load %arg0[%c0] : memref<16xi32, #tpu.memory_space<smem>>
    %1 = arith.index_cast %0 : i32 to index
    %c0_0 = arith.constant 0 : index
    %2 = vector.load %arg1[%1, %c0_0] : memref<65x32xf32, #tpu.memory_space<vmem>>, vector<1x32xf32>
    %c0_1 = arith.constant 0 : index
    %c0_2 = arith.constant 0 : index
    %3 = vector.load %arg2[%c0_1, %c0_2] : memref<64x32xf32, #tpu.memory_space<vmem>>, vector<1x32xf32>
    %4 = arith.addf %2, %3 : vector<1x32xf32>
    %c0_3 = arith.constant 0 : index
    %c0_4 = arith.constant 0 : index
    %5 = vector.load %arg19[%c0_3, %c0_4] : memref<16x32xf32, #tpu.memory_space<vmem>>, vector<1x32xf32>
    tpu.vector_store %arg19[%c0_3, %c0_4], %4 {strides = array<i32>} : memref<16x32xf32, #tpu.memory_space<vmem>>, vector<1x32xf32>,
    %c1 = arith.constant 1 : index
    %6 = memref.load %arg0[%c1] : memref<16xi32, #tpu.memory_space<smem>>
    %7 = arith.index_cast %6 : i32 to index
    %c0_5 = arith.constant 0 : index
    %8 = vector.load %arg1[%7, %c0_5] : memref<65x32xf32, #tpu.memory_space<vmem>>, vector<1x32xf32>
    %c1_6 = arith.constant 1 : index
    %c0_7 = arith.constant 0 : index
    %9 = vector.load %arg2[%c1_6, %c0_7] : memref<64x32xf32, #tpu.memory_space<vmem>>, vector<1x32xf32>
    %10 = arith.addf %8, %9 : vector<1x32xf32>
    %c1_8 = arith.constant 1 : index
    %c0_9 = arith.constant 0 : index
    %11 = vector.load %arg19[%c1_8, %c0_9] : memref<16x32xf32, #tpu.memory_space<vmem>>, vector<1x32xf32>
    tpu.vector_store %arg19[%c1_8, %c0_9], %10 {strides = array<i32>} : memref<16x32xf32, #tpu.memory_space<vmem>>, vector<1x32xf32>,
    %c2 = arith.constant 2 : index
    %12 = memref.load %arg0[%c2] : memref<16xi32, #tpu.memory_space<smem>>
    %13 = arith.index_cast %12 : i32 to index
    %c0_10 = arith.constant 0 : index
    %14 = vector.load %arg1[%13, %c0_10] : memref<65x32xf32, #tpu.memory_space<vmem>>, vector<1x32xf32>
    %c2_11 = arith.constant 2 : index
    %c0_12 = arith.constant 0 : index
    %15 = vector.load %arg2[%c2_11, %c0_12] : memref<64x32xf32, #tpu.memory_space<vmem>>, vector<1x32xf32>
    %16 = arith.addf %14, %15 : vector<1x32xf32>
    %c2_13 = arith.constant 2 : index
    %c0_14 = arith.constant 0 : index
    %17 = vector.load %arg19[%c2_13, %c0_14] : memref<16x32xf32, #tpu.memory_space<vmem>>, vector<1x32xf32>
    tpu.vector_store %arg19[%c2_13, %c0_14], %16 {strides = array<i32>} : memref<16x32xf32, #tpu.memory_space<vmem>>, vector<1x32xf32>,
    %c3 = arith.constant 3 : index
    %18 = memref.load %arg0[%c3] : memref<16xi32, #tpu.memory_space<smem>>
    %19 = arith.index_cast %18 : i32 to index
    %c0_15 = arith.constant 0 : index
    %20 = vector.load %arg1[%19, %c0_15] : memref<65x32xf32, #tpu.memory_space<vmem>>, vector<1x32xf32>
    %c3_16 = arith.constant 3 : index
    %c0_17 = arith.constant 0 : index
    %21 = vector.load %arg2[%c3_16, %c0_17] : memref<64x32xf32, #tpu.memory_space<vmem>>, vector<1x32xf32>
    %22 = arith.addf %20, %21 : vector<1x32xf32>
    %c3_18 = arith.constant 3 : index
    %c0_19 = arith.constant 0 : index
    %23 = vector.load %arg19[%c3_18, %c0_19] : memref<16x32xf32, #tpu.memory_space<vmem>>, vector<1x32xf32>
    tpu.vector_store %arg19[%c3_18, %c0_19], %22 {strides = array<i32>} : memref<16x32xf32, #tpu.memory_space<vmem>>, vector<1x32xf32>,
    %c4 = arith.constant 4 : index
    %24 = memref.load %arg0[%c4] : memref<16xi32, #tpu.memory_space<smem>>
    %25 = arith.index_cast %24 : i32 to index
    %c0_20 = arith.constant 0 : index
    %26 = vector.load %arg1[%25, %c0_20] : memref<65x32xf32, #tpu.memory_space<vmem>>, vector<1x32xf32>
    %c4_21 = arith.constant 4 : index
    %c0_22 = arith.constant 0 : index
    %27 = vector.load %arg2[%c4_21, %c0_22] : memref<64x32xf32, #tpu.memory_space<vmem>>, vector<1x32xf32>
    %28 = arith.addf %26, %27 : vector<1x32xf32>
    %c4_23 = arith.constant 4 : index
    %c0_24 = arith.constant 0 : index
    %29 = vector.load %arg19[%c4_23, %c0_24] : memref<16x32xf32, #tpu.memory_space<vmem>>, vector<1x32xf32>
    tpu.vector_store %arg19[%c4_23, %c0_24], %28 {strides = array<i32>} : memref<16x32xf32, #tpu.memory_space<vmem>>, vector<1x32xf32>,
    %c5 = arith.constant 5 : index
    %30 = memref.load %arg0[%c5] : memref<16xi32, #tpu.memory_space<smem>>
    %31 = arith.index_cast %30 : i32 to index
    %c0_25 = arith.constant 0 : index
    %32 = vector.load %arg1[%31, %c0_25] : memref<65x32xf32, #tpu.memory_space<vmem>>, vector<1x32xf32>
    %c5_26 = arith.constant 5 : index
    %c0_27 = arith.constant 0 : index
    %33 = vector.load %arg2[%c5_26, %c0_27] : memref<64x32xf32, #tpu.memory_space<vmem>>, vector<1x32xf32>
    %34 = arith.addf %32, %33 : vector<1x32xf32>
    %c5_28 = arith.constant 5 : index
    %c0_29 = arith.constant 0 : index
    %35 = vector.load %arg19[%c5_28, %c0_29] : memref<16x32xf32, #tpu.memory_space<vmem>>, vector<1x32xf32>
    tpu.vector_store %arg19[%c5_28, %c0_29], %34 {strides = array<i32>} : memref<16x32xf32, #tpu.memory_space<vmem>>, vector<1x32xf32>,
    %c6 = arith.constant 6 : index
    %36 = memref.load %arg0[%c6] : memref<16xi32, #tpu.memory_space<smem>>
    %37 = arith.index_cast %36 : i32 to index
    %c0_30 = arith.constant 0 : index
    %38 = vector.load %arg1[%37, %c0_30] : memref<65x32xf32, #tpu.memory_space<vmem>>, vector<1x32xf32>
    %c6_31 = arith.constant 6 : index
    %c0_32 = arith.constant 0 : index
    %39 = vector.load %arg2[%c6_31, %c0_32] : memref<64x32xf32, #tpu.memory_space<vmem>>, vector<1x32xf32>
    %40 = arith.addf %38, %39 : vector<1x32xf32>
    %c6_33 = arith.constant 6 : index
    %c0_34 = arith.constant 0 : index
    %41 = vector.load %arg19[%c6_33, %c0_34] : memref<16x32xf32, #tpu.memory_space<vmem>>, vector<1x32xf32>
    tpu.vector_store %arg19[%c6_33, %c0_34], %40 {strides = array<i32>} : memref<16x32xf32, #tpu.memory_space<vmem>>, vector<1x32xf32>,
    %c7 = arith.constant 7 : index
    %42 = memref.load %arg0[%c7] : memref<16xi32, #tpu.memory_space<smem>>
    %43 = arith.index_cast %42 : i32 to index
    %c0_35 = arith.constant 0 : index
    %44 = vector.load %arg1[%43, %c0_35] : memref<65x32xf32, #tpu.memory_space<vmem>>, vector<1x32xf32>
    %c7_36 = arith.constant 7 : index
    %c0_37 = arith.constant 0 : index
    %45 = vector.load %arg2[%c7_36, %c0_37] : memref<64x32xf32, #tpu.memory_space<vmem>>, vector<1x32xf32>
    %46 = arith.addf %44, %45 : vector<1x32xf32>
    %c7_38 = arith.constant 7 : index
    %c0_39 = arith.constant 0 : index
    %47 = vector.load %arg19[%c7_38, %c0_39] : memref<16x32xf32, #tpu.memory_space<vmem>>, vector<1x32xf32>
    tpu.vector_store %arg19[%c7_38, %c0_39], %46 {strides = array<i32>} : memref<16x32xf32, #tpu.memory_space<vmem>>, vector<1x32xf32>,
    %c8 = arith.constant 8 : index
    %48 = memref.load %arg0[%c8] : memref<16xi32, #tpu.memory_space<smem>>
    %49 = arith.index_cast %48 : i32 to index
    %c0_40 = arith.constant 0 : index
    %50 = vector.load %arg1[%49, %c0_40] : memref<65x32xf32, #tpu.memory_space<vmem>>, vector<1x32xf32>
    %c0_41 = arith.constant 0 : index
    %c0_42 = arith.constant 0 : index
    %51 = vector.load %arg2[%c0_41, %c0_42] : memref<64x32xf32, #tpu.memory_space<vmem>>, vector<1x32xf32>
    %52 = arith.addf %50, %51 : vector<1x32xf32>
    %c8_43 = arith.constant 8 : index
    %c0_44 = arith.constant 0 : index
    %53 = vector.load %arg19[%c8_43, %c0_44] : memref<16x32xf32, #tpu.memory_space<vmem>>, vector<1x32xf32>
    tpu.vector_store %arg19[%c8_43, %c0_44], %52 {strides = array<i32>} : memref<16x32xf32, #tpu.memory_space<vmem>>, vector<1x32xf32>,
    %c9 = arith.constant 9 : index
    %54 = memref.load %arg0[%c9] : memref<16xi32, #tpu.memory_space<smem>>
    %55 = arith.index_cast %54 : i32 to index
    %c0_45 = arith.constant 0 : index
    %56 = vector.load %arg1[%55, %c0_45] : memref<65x32xf32, #tpu.memory_space<vmem>>, vector<1x32xf32>
    %c1_46 = arith.constant 1 : index
    %c0_47 = arith.constant 0 : index
    %57 = vector.load %arg2[%c1_46, %c0_47] : memref<64x32xf32, #tpu.memory_space<vmem>>, vector<1x32xf32>
    %58 = arith.addf %56, %57 : vector<1x32xf32>
    %c9_48 = arith.constant 9 : index
    %c0_49 = arith.constant 0 : index
    %59 = vector.load %arg19[%c9_48, %c0_49] : memref<16x32xf32, #tpu.memory_space<vmem>>, vector<1x32xf32>
    tpu.vector_store %arg19[%c9_48, %c0_49], %58 {strides = array<i32>} : memref<16x32xf32, #tpu.memory_space<vmem>>, vector<1x32xf32>,
    %c10 = arith.constant 10 : index
    %60 = memref.load %arg0[%c10] : memref<16xi32, #tpu.memory_space<smem>>
    %61 = arith.index_cast %60 : i32 to index
    %c0_50 = arith.constant 0 : index
    %62 = vector.load %arg1[%61, %c0_50] : memref<65x32xf32, #tpu.memory_space<vmem>>, vector<1x32xf32>
    %c2_51 = arith.constant 2 : index
    %c0_52 = arith.constant 0 : index
    %63 = vector.load %arg2[%c2_51, %c0_52] : memref<64x32xf32, #tpu.memory_space<vmem>>, vector<1x32xf32>
    %64 = arith.addf %62, %63 : vector<1x32xf32>
    %c10_53 = arith.constant 10 : index
    %c0_54 = arith.constant 0 : index
    %65 = vector.load %arg19[%c10_53, %c0_54] : memref<16x32xf32, #tpu.memory_space<vmem>>, vector<1x32xf32>
    tpu.vector_store %arg19[%c10_53, %c0_54], %64 {strides = array<i32>} : memref<16x32xf32, #tpu.memory_space<vmem>>, vector<1x32xf32>,
    %c11 = arith.constant 11 : index
    %66 = memref.load %arg0[%c11] : memref<16xi32, #tpu.memory_space<smem>>
    %67 = arith.index_cast %66 : i32 to index
    %c0_55 = arith.constant 0 : index
    %68 = vector.load %arg1[%67, %c0_55] : memref<65x32xf32, #tpu.memory_space<vmem>>, vector<1x32xf32>
    %c3_56 = arith.constant 3 : index
    %c0_57 = arith.constant 0 : index
    %69 = vector.load %arg2[%c3_56, %c0_57] : memref<64x32xf32, #tpu.memory_space<vmem>>, vector<1x32xf32>
    %70 = arith.addf %68, %69 : vector<1x32xf32>
    %c11_58 = arith.constant 11 : index
    %c0_59 = arith.constant 0 : index
    %71 = vector.load %arg19[%c11_58, %c0_59] : memref<16x32xf32, #tpu.memory_space<vmem>>, vector<1x32xf32>
    tpu.vector_store %arg19[%c11_58, %c0_59], %70 {strides = array<i32>} : memref<16x32xf32, #tpu.memory_space<vmem>>, vector<1x32xf32>,
    %c12 = arith.constant 12 : index
    %72 = memref.load %arg0[%c12] : memref<16xi32, #tpu.memory_space<smem>>
    %73 = arith.index_cast %72 : i32 to index
    %c0_60 = arith.constant 0 : index
    %74 = vector.load %arg1[%73, %c0_60] : memref<65x32xf32, #tpu.memory_space<vmem>>, vector<1x32xf32>
    %c4_61 = arith.constant 4 : index
    %c0_62 = arith.constant 0 : index
    %75 = vector.load %arg2[%c4_61, %c0_62] : memref<64x32xf32, #tpu.memory_space<vmem>>, vector<1x32xf32>
    %76 = arith.addf %74, %75 : vector<1x32xf32>
    %c12_63 = arith.constant 12 : index
    %c0_64 = arith.constant 0 : index
    %77 = vector.load %arg19[%c12_63, %c0_64] : memref<16x32xf32, #tpu.memory_space<vmem>>, vector<1x32xf32>
    tpu.vector_store %arg19[%c12_63, %c0_64], %76 {strides = array<i32>} : memref<16x32xf32, #tpu.memory_space<vmem>>, vector<1x32xf32>,
    %c13 = arith.constant 13 : index
    %78 = memref.load %arg0[%c13] : memref<16xi32, #tpu.memory_space<smem>>
    %79 = arith.index_cast %78 : i32 to index
    %c0_65 = arith.constant 0 : index
    %80 = vector.load %arg1[%79, %c0_65] : memref<65x32xf32, #tpu.memory_space<vmem>>, vector<1x32xf32>
    %c5_66 = arith.constant 5 : index
    %c0_67 = arith.constant 0 : index
    %81 = vector.load %arg2[%c5_66, %c0_67] : memref<64x32xf32, #tpu.memory_space<vmem>>, vector<1x32xf32>
    %82 = arith.addf %80, %81 : vector<1x32xf32>
    %c13_68 = arith.constant 13 : index
    %c0_69 = arith.constant 0 : index
    %83 = vector.load %arg19[%c13_68, %c0_69] : memref<16x32xf32, #tpu.memory_space<vmem>>, vector<1x32xf32>
    tpu.vector_store %arg19[%c13_68, %c0_69], %82 {strides = array<i32>} : memref<16x32xf32, #tpu.memory_space<vmem>>, vector<1x32xf32>,
    %c14 = arith.constant 14 : index
    %84 = memref.load %arg0[%c14] : memref<16xi32, #tpu.memory_space<smem>>
    %85 = arith.index_cast %84 : i32 to index
    %c0_70 = arith.constant 0 : index
    %86 = vector.load %arg1[%85, %c0_70] : memref<65x32xf32, #tpu.memory_space<vmem>>, vector<1x32xf32>
    %c6_71 = arith.constant 6 : index
    %c0_72 = arith.constant 0 : index
    %87 = vector.load %arg2[%c6_71, %c0_72] : memref<64x32xf32, #tpu.memory_space<vmem>>, vector<1x32xf32>
    %88 = arith.addf %86, %87 : vector<1x32xf32>
    %c14_73 = arith.constant 14 : index
    %c0_74 = arith.constant 0 : index
    %89 = vector.load %arg19[%c14_73, %c0_74] : memref<16x32xf32, #tpu.memory_space<vmem>>, vector<1x32xf32>
    tpu.vector_store %arg19[%c14_73, %c0_74], %88 {strides = array<i32>} : memref<16x32xf32, #tpu.memory_space<vmem>>, vector<1x32xf32>,
    %c15 = arith.constant 15 : index
    %90 = memref.load %arg0[%c15] : memref<16xi32, #tpu.memory_space<smem>>
    %91 = arith.index_cast %90 : i32 to index
    %c0_75 = arith.constant 0 : index
    %92 = vector.load %arg1[%91, %c0_75] : memref<65x32xf32, #tpu.memory_space<vmem>>, vector<1x32xf32>
    %c7_76 = arith.constant 7 : index
    %c0_77 = arith.constant 0 : index
    %93 = vector.load %arg2[%c7_76, %c0_77] : memref<64x32xf32, #tpu.memory_space<vmem>>, vector<1x32xf32>
    %94 = arith.addf %92, %93 : vector<1x32xf32>
    %c15_78 = arith.constant 15 : index
    %c0_79 = arith.constant 0 : index
    %95 = vector.load %arg19[%c15_78, %c0_79] : memref<16x32xf32, #tpu.memory_space<vmem>>, vector<1x32xf32>
    tpu.vector_store %arg19[%c15_78, %c0_79], %94 {strides = array<i32>} : memref<16x32xf32, #tpu.memory_space<vmem>>, vector<1x32xf32>,
    %c0_80 = arith.constant 0 : index
    %c0_81 = arith.constant 0 : index
    %96 = vector.load %arg19[%c0_80, %c0_81] : memref<16x32xf32, #tpu.memory_space<vmem>>, vector<16x32xf32>
    %97 = tpu.iota {dimensions = array<i32: 0>} : vector<16x16xi32>
    %98 = tpu.iota {dimensions = array<i32: 1>} : vector<16x16xi32>
    %c3_i32 = arith.constant 3 : i32
    %99 = vector.broadcast %c3_i32 : i32 to vector<16x16xi32>
    %100 = arith.shrui %97, %99 : vector<16x16xi32>
    %c3_i32_82 = arith.constant 3 : i32
    %101 = vector.broadcast %c3_i32_82 : i32 to vector<16x16xi32>
    %102 = arith.shrui %98, %101 : vector<16x16xi32>
    %103 = arith.cmpi eq, %100, %102 : vector<16x16xi32>
    %104 = arith.cmpi sle, %98, %97 : vector<16x16xi32>
    %105 = arith.andi %103, %104 : vector<16x16xi1>
    %cst = arith.constant 0.353553385 : f32
    %cst_83 = arith.constant 0.000000e+00 : f32
    %106 = vector.broadcast %cst : f32 to vector<16x16xf32>
    %107 = vector.broadcast %cst_83 : f32 to vector<16x16xf32>
    %108 = arith.select %105, %106, %107 : vector<16x16xi1>, vector<16x16xf32>
    %cst_84 = arith.constant -2.000000e+01 : f32
    %cst_85 = arith.constant -1.000000e+30 : f32
    %109 = vector.broadcast %cst_84 : f32 to vector<16x16xf32>
    %110 = vector.broadcast %cst_85 : f32 to vector<16x16xf32>
    %111 = arith.select %103, %109, %110 : vector<16x16xi1>, vector<16x16xf32>
    %cst_86 = arith.constant 0.000000e+00 : f32
    %112 = vector.broadcast %cst_86 : f32 to vector<16x16xf32>
    %113 = arith.select %105, %112, %111 : vector<16x16xi1>, vector<16x16xf32>
    %114 = tpu.concatenate %108, %108, %108, %108 in 0 : vector<16x16xf32>, vector<16x16xf32>, vector<16x16xf32>, vector<16x16xf32> -> vector<64x16xf32>
    %115 = tpu.concatenate %113, %113, %113, %113 in 0 : vector<16x16xf32>, vector<16x16xf32>, vector<16x16xf32>, vector<16x16xf32> -> vector<64x16xf32>
    %c0_87 = arith.constant 0 : index
    %c0_88 = arith.constant 0 : index
    %c0_89 = arith.constant 0 : index
    %116 = vector.load %arg3[%c0_87, %c0_88, %c0_89] : memref<2x1x32xf32, #tpu.memory_space<vmem>>, vector<1x1x32xf32>
    %117 = vector.shape_cast %116 : vector<1x1x32xf32> to vector<1x32xf32>
    %c0_90 = arith.constant 0 : index
    %c0_91 = arith.constant 0 : index
    %c0_92 = arith.constant 0 : index
    %118 = vector.load %arg4[%c0_90, %c0_91, %c0_92] : memref<2x1x32xf32, #tpu.memory_space<vmem>>, vector<1x1x32xf32>
    %119 = vector.shape_cast %118 : vector<1x1x32xf32> to vector<1x32xf32>
    %cst_93 = arith.constant dense<0.000000e+00> : vector<16xf32>
    %120 = vector.multi_reduction <add>, %96, %cst_93 [1] : vector<16x32xf32> to vector<16xf32>
    %121 = vector.shape_cast %120 : vector<16xf32> to vector<16x1xf32>
    %cst_94 = arith.constant 3.200000e+01 : f32
    %122 = vector.broadcast %cst_94 : f32 to vector<16x1xf32>
    %123 = arith.divf %121, %122 : vector<16x1xf32>
    %124 = vector.broadcast %123 : vector<16x1xf32> to vector<16x32xf32>
    %125 = arith.subf %96, %124 : vector<16x32xf32>
    %126 = arith.mulf %125, %125 : vector<16x32xf32>
    %cst_95 = arith.constant dense<0.000000e+00> : vector<16xf32>
    %127 = vector.multi_reduction <add>, %126, %cst_95 [1] : vector<16x32xf32> to vector<16xf32>
    %128 = vector.shape_cast %127 : vector<16xf32> to vector<16x1xf32>
    %cst_96 = arith.constant 3.200000e+01 : f32
    %129 = vector.broadcast %cst_96 : f32 to vector<16x1xf32>
    %130 = arith.divf %128, %129 : vector<16x1xf32>
    %131 = vector.broadcast %123 : vector<16x1xf32> to vector<16x32xf32>
    %132 = arith.subf %96, %131 : vector<16x32xf32>
    %cst_97 = arith.constant 9.99999974E-6 : f32
    %133 = vector.broadcast %cst_97 : f32 to vector<16x1xf32>
    %134 = arith.addf %130, %133 : vector<16x1xf32>
    %135 = math.rsqrt %134 : vector<16x1xf32>
    %136 = vector.broadcast %135 : vector<16x1xf32> to vector<16x32xf32>
    %137 = arith.mulf %132, %136 : vector<16x32xf32>
    %138 = vector.broadcast %117 : vector<1x32xf32> to vector<16x32xf32>
    %139 = arith.mulf %137, %138 : vector<16x32xf32>
    %140 = vector.broadcast %119 : vector<1x32xf32> to vector<16x32xf32>
    %141 = arith.addf %139, %140 : vector<16x32xf32>
    %142 = arith.truncf %141 : vector<16x32xf32> to vector<16x32xbf16>
    %c0_98 = arith.constant 0 : index
    %c0_99 = arith.constant 0 : index
    %c0_100 = arith.constant 0 : index
    %143 = vector.load %arg5[%c0_98, %c0_99, %c0_100] : memref<2x32x96xbf16, #tpu.memory_space<vmem>>, vector<1x32x96xbf16>
    %144 = vector.shape_cast %143 : vector<1x32x96xbf16> to vector<32x96xbf16>
    %cst_101 = arith.constant dense<0.000000e+00> : vector<16x96xf32>
    %145 = tpu.matmul %142, %144, %cst_101 {dimension_numbers = #tpu.dot_dimension_numbers<[1], [0], [0], [1], [0, 0, 1, 1], [], []>} : vector<16x32xbf16>, vector<32x96xbf16>, vector<16x96xf32> -> vector<16x96xf32>
    %c0_102 = arith.constant 0 : index
    %c0_103 = arith.constant 0 : index
    %c0_104 = arith.constant 0 : index
    %146 = vector.load %arg6[%c0_102, %c0_103, %c0_104] : memref<2x1x96xf32, #tpu.memory_space<vmem>>, vector<1x1x96xf32>
    %147 = vector.shape_cast %146 : vector<1x1x96xf32> to vector<1x96xf32>
    %148 = vector.broadcast %147 : vector<1x96xf32> to vector<16x96xf32>
    %149 = arith.addf %145, %148 : vector<16x96xf32>
    %150 = arith.truncf %149 : vector<16x96xf32> to vector<16x96xbf16>
    %151 = vector.extract_strided_slice %150 {offsets = [0, 0], sizes = [16, 8], strides = [1, 1]} : vector<16x96xbf16> to vector<16x8xbf16>
    %152 = vector.extract_strided_slice %150 {offsets = [0, 32], sizes = [16, 8], strides = [1, 1]} : vector<16x96xbf16> to vector<16x8xbf16>
    %cst_105 = arith.constant dense<0.000000e+00> : vector<16x16xf32>
    %153 = tpu.matmul %151, %152, %cst_105 {dimension_numbers = #tpu.dot_dimension_numbers<[1], [1], [0], [0], [0, 0, 1, 0], [], []>} : vector<16x8xbf16>, vector<16x8xbf16>, vector<16x16xf32> -> vector<16x16xf32>
    %154 = vector.extract_strided_slice %150 {offsets = [0, 8], sizes = [16, 8], strides = [1, 1]} : vector<16x96xbf16> to vector<16x8xbf16>
    %155 = vector.extract_strided_slice %150 {offsets = [0, 40], sizes = [16, 8], strides = [1, 1]} : vector<16x96xbf16> to vector<16x8xbf16>
    %cst_106 = arith.constant dense<0.000000e+00> : vector<16x16xf32>
    %156 = tpu.matmul %154, %155, %cst_106 {dimension_numbers = #tpu.dot_dimension_numbers<[1], [1], [0], [0], [0, 0, 1, 0], [], []>} : vector<16x8xbf16>, vector<16x8xbf16>, vector<16x16xf32> -> vector<16x16xf32>
    %157 = vector.extract_strided_slice %150 {offsets = [0, 16], sizes = [16, 8], strides = [1, 1]} : vector<16x96xbf16> to vector<16x8xbf16>
    %158 = vector.extract_strided_slice %150 {offsets = [0, 48], sizes = [16, 8], strides = [1, 1]} : vector<16x96xbf16> to vector<16x8xbf16>
    %cst_107 = arith.constant dense<0.000000e+00> : vector<16x16xf32>
    %159 = tpu.matmul %157, %158, %cst_107 {dimension_numbers = #tpu.dot_dimension_numbers<[1], [1], [0], [0], [0, 0, 1, 0], [], []>} : vector<16x8xbf16>, vector<16x8xbf16>, vector<16x16xf32> -> vector<16x16xf32>
    %160 = vector.extract_strided_slice %150 {offsets = [0, 24], sizes = [16, 8], strides = [1, 1]} : vector<16x96xbf16> to vector<16x8xbf16>
    %161 = vector.extract_strided_slice %150 {offsets = [0, 56], sizes = [16, 8], strides = [1, 1]} : vector<16x96xbf16> to vector<16x8xbf16>
    %cst_108 = arith.constant dense<0.000000e+00> : vector<16x16xf32>
    %162 = tpu.matmul %160, %161, %cst_108 {dimension_numbers = #tpu.dot_dimension_numbers<[1], [1], [0], [0], [0, 0, 1, 0], [], []>} : vector<16x8xbf16>, vector<16x8xbf16>, vector<16x16xf32> -> vector<16x16xf32>
    %163 = tpu.concatenate %153, %156, %159, %162 in 0 : vector<16x16xf32>, vector<16x16xf32>, vector<16x16xf32>, vector<16x16xf32> -> vector<64x16xf32>
    %164 = arith.mulf %163, %114 : vector<64x16xf32>
    %165 = arith.addf %164, %115 : vector<64x16xf32>
    %cst_109 = arith.constant dense<0xFF800000> : vector<64xf32>
    %166 = vector.multi_reduction <maximumf>, %165, %cst_109 [1] : vector<64x16xf32> to vector<64xf32>
    %167 = vector.shape_cast %166 : vector<64xf32> to vector<64x1xf32>
    %168 = vector.broadcast %167 : vector<64x1xf32> to vector<64x16xf32>
    %169 = arith.subf %165, %168 : vector<64x16xf32>
    %170 = math.exp %169 : vector<64x16xf32>
    %cst_110 = arith.constant dense<0.000000e+00> : vector<64xf32>
    %171 = vector.multi_reduction <add>, %170, %cst_110 [1] : vector<64x16xf32> to vector<64xf32>
    %172 = vector.shape_cast %171 : vector<64xf32> to vector<64x1xf32>
    %173 = tpu.reciprocal %172 {approx = true} : vector<64x1xf32> -> vector<64x1xf32>
    %174 = vector.broadcast %173 : vector<64x1xf32> to vector<64x16xf32>
    %175 = arith.mulf %170, %174 : vector<64x16xf32>
    %176 = arith.truncf %175 : vector<64x16xf32> to vector<64x16xbf16>
    %177 = vector.extract_strided_slice %176 {offsets = [0, 0], sizes = [16, 16], strides = [1, 1]} : vector<64x16xbf16> to vector<16x16xbf16>
    %178 = vector.extract_strided_slice %150 {offsets = [0, 64], sizes = [16, 8], strides = [1, 1]} : vector<16x96xbf16> to vector<16x8xbf16>
    %cst_111 = arith.constant dense<0.000000e+00> : vector<16x8xf32>
    %179 = tpu.matmul %177, %178, %cst_111 {dimension_numbers = #tpu.dot_dimension_numbers<[1], [0], [0], [1], [0, 0, 1, 1], [], []>} : vector<16x16xbf16>, vector<16x8xbf16>, vector<16x8xf32> -> vector<16x8xf32>
    %180 = vector.extract_strided_slice %176 {offsets = [16, 0], sizes = [16, 16], strides = [1, 1]} : vector<64x16xbf16> to vector<16x16xbf16>
    %181 = vector.extract_strided_slice %150 {offsets = [0, 72], sizes = [16, 8], strides = [1, 1]} : vector<16x96xbf16> to vector<16x8xbf16>
    %cst_112 = arith.constant dense<0.000000e+00> : vector<16x8xf32>
    %182 = tpu.matmul %180, %181, %cst_112 {dimension_numbers = #tpu.dot_dimension_numbers<[1], [0], [0], [1], [0, 0, 1, 1], [], []>} : vector<16x16xbf16>, vector<16x8xbf16>, vector<16x8xf32> -> vector<16x8xf32>
    %183 = vector.extract_strided_slice %176 {offsets = [32, 0], sizes = [16, 16], strides = [1, 1]} : vector<64x16xbf16> to vector<16x16xbf16>
    %184 = vector.extract_strided_slice %150 {offsets = [0, 80], sizes = [16, 8], strides = [1, 1]} : vector<16x96xbf16> to vector<16x8xbf16>
    %cst_113 = arith.constant dense<0.000000e+00> : vector<16x8xf32>
    %185 = tpu.matmul %183, %184, %cst_113 {dimension_numbers = #tpu.dot_dimension_numbers<[1], [0], [0], [1], [0, 0, 1, 1], [], []>} : vector<16x16xbf16>, vector<16x8xbf16>, vector<16x8xf32> -> vector<16x8xf32>
    %186 = vector.extract_strided_slice %176 {offsets = [48, 0], sizes = [16, 16], strides = [1, 1]} : vector<64x16xbf16> to vector<16x16xbf16>
    %187 = vector.extract_strided_slice %150 {offsets = [0, 88], sizes = [16, 8], strides = [1, 1]} : vector<16x96xbf16> to vector<16x8xbf16>
    %cst_114 = arith.constant dense<0.000000e+00> : vector<16x8xf32>
    %188 = tpu.matmul %186, %187, %cst_114 {dimension_numbers = #tpu.dot_dimension_numbers<[1], [0], [0], [1], [0, 0, 1, 1], [], []>} : vector<16x16xbf16>, vector<16x8xbf16>, vector<16x8xf32> -> vector<16x8xf32>
    %189 = tpu.concatenate %179, %182, %185, %188 in 1 : vector<16x8xf32>, vector<16x8xf32>, vector<16x8xf32>, vector<16x8xf32> -> vector<16x32xf32>
    %190 = arith.truncf %189 : vector<16x32xf32> to vector<16x32xbf16>
    %c0_115 = arith.constant 0 : index
    %c0_116 = arith.constant 0 : index
    %c0_117 = arith.constant 0 : index
    %191 = vector.load %arg7[%c0_115, %c0_116, %c0_117] : memref<2x32x32xbf16, #tpu.memory_space<vmem>>, vector<1x32x32xbf16>
    %192 = vector.shape_cast %191 : vector<1x32x32xbf16> to vector<32x32xbf16>
    %cst_118 = arith.constant dense<0.000000e+00> : vector<16x32xf32>
    %193 = tpu.matmul %190, %192, %cst_118 {dimension_numbers = #tpu.dot_dimension_numbers<[1], [0], [0], [1], [0, 0, 1, 1], [], []>} : vector<16x32xbf16>, vector<32x32xbf16>, vector<16x32xf32> -> vector<16x32xf32>
    %c0_119 = arith.constant 0 : index
    %c0_120 = arith.constant 0 : index
    %c0_121 = arith.constant 0 : index
    %194 = vector.load %arg8[%c0_119, %c0_120, %c0_121] : memref<2x1x32xf32, #tpu.memory_space<vmem>>, vector<1x1x32xf32>
    %195 = vector.shape_cast %194 : vector<1x1x32xf32> to vector<1x32xf32>
    %196 = vector.broadcast %195 : vector<1x32xf32> to vector<16x32xf32>
    %197 = arith.addf %193, %196 : vector<16x32xf32>
    %198 = arith.addf %96, %197 : vector<16x32xf32>
    %c0_122 = arith.constant 0 : index
    %c0_123 = arith.constant 0 : index
    %c0_124 = arith.constant 0 : index
    %199 = vector.load %arg9[%c0_122, %c0_123, %c0_124] : memref<2x1x32xf32, #tpu.memory_space<vmem>>, vector<1x1x32xf32>
    %200 = vector.shape_cast %199 : vector<1x1x32xf32> to vector<1x32xf32>
    %c0_125 = arith.constant 0 : index
    %c0_126 = arith.constant 0 : index
    %c0_127 = arith.constant 0 : index
    %201 = vector.load %arg10[%c0_125, %c0_126, %c0_127] : memref<2x1x32xf32, #tpu.memory_space<vmem>>, vector<1x1x32xf32>
    %202 = vector.shape_cast %201 : vector<1x1x32xf32> to vector<1x32xf32>
    %cst_128 = arith.constant dense<0.000000e+00> : vector<16xf32>
    %203 = vector.multi_reduction <add>, %198, %cst_128 [1] : vector<16x32xf32> to vector<16xf32>
    %204 = vector.shape_cast %203 : vector<16xf32> to vector<16x1xf32>
    %cst_129 = arith.constant 3.200000e+01 : f32
    %205 = vector.broadcast %cst_129 : f32 to vector<16x1xf32>
    %206 = arith.divf %204, %205 : vector<16x1xf32>
    %207 = vector.broadcast %206 : vector<16x1xf32> to vector<16x32xf32>
    %208 = arith.subf %198, %207 : vector<16x32xf32>
    %209 = arith.mulf %208, %208 : vector<16x32xf32>
    %cst_130 = arith.constant dense<0.000000e+00> : vector<16xf32>
    %210 = vector.multi_reduction <add>, %209, %cst_130 [1] : vector<16x32xf32> to vector<16xf32>
    %211 = vector.shape_cast %210 : vector<16xf32> to vector<16x1xf32>
    %cst_131 = arith.constant 3.200000e+01 : f32
    %212 = vector.broadcast %cst_131 : f32 to vector<16x1xf32>
    %213 = arith.divf %211, %212 : vector<16x1xf32>
    %214 = vector.broadcast %206 : vector<16x1xf32> to vector<16x32xf32>
    %215 = arith.subf %198, %214 : vector<16x32xf32>
    %cst_132 = arith.constant 9.99999974E-6 : f32
    %216 = vector.broadcast %cst_132 : f32 to vector<16x1xf32>
    %217 = arith.addf %213, %216 : vector<16x1xf32>
    %218 = math.rsqrt %217 : vector<16x1xf32>
    %219 = vector.broadcast %218 : vector<16x1xf32> to vector<16x32xf32>
    %220 = arith.mulf %215, %219 : vector<16x32xf32>
    %221 = vector.broadcast %200 : vector<1x32xf32> to vector<16x32xf32>
    %222 = arith.mulf %220, %221 : vector<16x32xf32>
    %223 = vector.broadcast %202 : vector<1x32xf32> to vector<16x32xf32>
    %224 = arith.addf %222, %223 : vector<16x32xf32>
    %225 = arith.truncf %224 : vector<16x32xf32> to vector<16x32xbf16>
    %c0_133 = arith.constant 0 : index
    %c0_134 = arith.constant 0 : index
    %c0_135 = arith.constant 0 : index
    %226 = vector.load %arg11[%c0_133, %c0_134, %c0_135] : memref<2x32x128xbf16, #tpu.memory_space<vmem>>, vector<1x32x128xbf16>
    %227 = vector.shape_cast %226 : vector<1x32x128xbf16> to vector<32x128xbf16>
    %cst_136 = arith.constant dense<0.000000e+00> : vector<16x128xf32>
    %228 = tpu.matmul %225, %227, %cst_136 {dimension_numbers = #tpu.dot_dimension_numbers<[1], [0], [0], [1], [0, 0, 1, 1], [], []>} : vector<16x32xbf16>, vector<32x128xbf16>, vector<16x128xf32> -> vector<16x128xf32>
    %c0_137 = arith.constant 0 : index
    %c0_138 = arith.constant 0 : index
    %c0_139 = arith.constant 0 : index
    %229 = vector.load %arg12[%c0_137, %c0_138, %c0_139] : memref<2x1x128xf32, #tpu.memory_space<vmem>>, vector<1x1x128xf32>
    %230 = vector.shape_cast %229 : vector<1x1x128xf32> to vector<1x128xf32>
    %231 = vector.broadcast %230 : vector<1x128xf32> to vector<16x128xf32>
    %232 = arith.addf %228, %231 : vector<16x128xf32>
    %cst_140 = arith.constant 5.000000e-01 : f32
    %233 = vector.broadcast %cst_140 : f32 to vector<16x128xf32>
    %234 = arith.mulf %233, %232 : vector<16x128xf32>
    %cst_141 = arith.constant 4.471500e-02 : f32
    %235 = vector.broadcast %cst_141 : f32 to vector<16x128xf32>
    %236 = arith.mulf %235, %232 : vector<16x128xf32>
    %237 = arith.mulf %236, %232 : vector<16x128xf32>
    %238 = arith.mulf %237, %232 : vector<16x128xf32>
    %239 = arith.addf %232, %238 : vector<16x128xf32>
    %cst_142 = arith.constant 0.797884583 : f32
    %240 = vector.broadcast %cst_142 : f32 to vector<16x128xf32>
    %241 = arith.mulf %240, %239 : vector<16x128xf32>
    %242 = math.tanh %241 : vector<16x128xf32>
    %cst_143 = arith.constant 1.000000e+00 : f32
    %243 = vector.broadcast %cst_143 : f32 to vector<16x128xf32>
    %244 = arith.addf %243, %242 : vector<16x128xf32>
    %245 = arith.mulf %234, %244 : vector<16x128xf32>
    %246 = arith.truncf %245 : vector<16x128xf32> to vector<16x128xbf16>
    %c0_144 = arith.constant 0 : index
    %c0_145 = arith.constant 0 : index
    %c0_146 = arith.constant 0 : index
    %247 = vector.load %arg13[%c0_144, %c0_145, %c0_146] : memref<2x128x32xbf16, #tpu.memory_space<vmem>>, vector<1x128x32xbf16>
    %248 = vector.shape_cast %247 : vector<1x128x32xbf16> to vector<128x32xbf16>
    %cst_147 = arith.constant dense<0.000000e+00> : vector<16x32xf32>
    %249 = tpu.matmul %246, %248, %cst_147 {dimension_numbers = #tpu.dot_dimension_numbers<[1], [0], [0], [1], [0, 0, 1, 1], [], []>} : vector<16x128xbf16>, vector<128x32xbf16>, vector<16x32xf32> -> vector<16x32xf32>
    %c0_148 = arith.constant 0 : index
    %c0_149 = arith.constant 0 : index
    %c0_150 = arith.constant 0 : index
    %250 = vector.load %arg14[%c0_148, %c0_149, %c0_150] : memref<2x1x32xf32, #tpu.memory_space<vmem>>, vector<1x1x32xf32>
    %251 = vector.shape_cast %250 : vector<1x1x32xf32> to vector<1x32xf32>
    %252 = vector.broadcast %251 : vector<1x32xf32> to vector<16x32xf32>
    %253 = arith.addf %249, %252 : vector<16x32xf32>
    %254 = arith.addf %198, %253 : vector<16x32xf32>
    %c1_151 = arith.constant 1 : index
    %c0_152 = arith.constant 0 : index
    %c0_153 = arith.constant 0 : index
    %255 = vector.load %arg3[%c1_151, %c0_152, %c0_153] : memref<2x1x32xf32, #tpu.memory_space<vmem>>, vector<1x1x32xf32>
    %256 = vector.shape_cast %255 : vector<1x1x32xf32> to vector<1x32xf32>
    %c1_154 = arith.constant 1 : index
    %c0_155 = arith.constant 0 : index
    %c0_156 = arith.constant 0 : index
    %257 = vector.load %arg4[%c1_154, %c0_155, %c0_156] : memref<2x1x32xf32, #tpu.memory_space<vmem>>, vector<1x1x32xf32>
    %258 = vector.shape_cast %257 : vector<1x1x32xf32> to vector<1x32xf32>
    %cst_157 = arith.constant dense<0.000000e+00> : vector<16xf32>
    %259 = vector.multi_reduction <add>, %254, %cst_157 [1] : vector<16x32xf32> to vector<16xf32>
    %260 = vector.shape_cast %259 : vector<16xf32> to vector<16x1xf32>
    %cst_158 = arith.constant 3.200000e+01 : f32
    %261 = vector.broadcast %cst_158 : f32 to vector<16x1xf32>
    %262 = arith.divf %260, %261 : vector<16x1xf32>
    %263 = vector.broadcast %262 : vector<16x1xf32> to vector<16x32xf32>
    %264 = arith.subf %254, %263 : vector<16x32xf32>
    %265 = arith.mulf %264, %264 : vector<16x32xf32>
    %cst_159 = arith.constant dense<0.000000e+00> : vector<16xf32>
    %266 = vector.multi_reduction <add>, %265, %cst_159 [1] : vector<16x32xf32> to vector<16xf32>
    %267 = vector.shape_cast %266 : vector<16xf32> to vector<16x1xf32>
    %cst_160 = arith.constant 3.200000e+01 : f32
    %268 = vector.broadcast %cst_160 : f32 to vector<16x1xf32>
    %269 = arith.divf %267, %268 : vector<16x1xf32>
    %270 = vector.broadcast %262 : vector<16x1xf32> to vector<16x32xf32>
    %271 = arith.subf %254, %270 : vector<16x32xf32>
    %cst_161 = arith.constant 9.99999974E-6 : f32
    %272 = vector.broadcast %cst_161 : f32 to vector<16x1xf32>
    %273 = arith.addf %269, %272 : vector<16x1xf32>
    %274 = math.rsqrt %273 : vector<16x1xf32>
    %275 = vector.broadcast %274 : vector<16x1xf32> to vector<16x32xf32>
    %276 = arith.mulf %271, %275 : vector<16x32xf32>
    %277 = vector.broadcast %256 : vector<1x32xf32> to vector<16x32xf32>
    %278 = arith.mulf %276, %277 : vector<16x32xf32>
    %279 = vector.broadcast %258 : vector<1x32xf32> to vector<16x32xf32>
    %280 = arith.addf %278, %279 : vector<16x32xf32>
    %281 = arith.truncf %280 : vector<16x32xf32> to vector<16x32xbf16>
    %c1_162 = arith.constant 1 : index
    %c0_163 = arith.constant 0 : index
    %c0_164 = arith.constant 0 : index
    %282 = vector.load %arg5[%c1_162, %c0_163, %c0_164] : memref<2x32x96xbf16, #tpu.memory_space<vmem>>, vector<1x32x96xbf16>
    %283 = vector.shape_cast %282 : vector<1x32x96xbf16> to vector<32x96xbf16>
    %cst_165 = arith.constant dense<0.000000e+00> : vector<16x96xf32>
    %284 = tpu.matmul %281, %283, %cst_165 {dimension_numbers = #tpu.dot_dimension_numbers<[1], [0], [0], [1], [0, 0, 1, 1], [], []>} : vector<16x32xbf16>, vector<32x96xbf16>, vector<16x96xf32> -> vector<16x96xf32>
    %c1_166 = arith.constant 1 : index
    %c0_167 = arith.constant 0 : index
    %c0_168 = arith.constant 0 : index
    %285 = vector.load %arg6[%c1_166, %c0_167, %c0_168] : memref<2x1x96xf32, #tpu.memory_space<vmem>>, vector<1x1x96xf32>
    %286 = vector.shape_cast %285 : vector<1x1x96xf32> to vector<1x96xf32>
    %287 = vector.broadcast %286 : vector<1x96xf32> to vector<16x96xf32>
    %288 = arith.addf %284, %287 : vector<16x96xf32>
    %289 = arith.truncf %288 : vector<16x96xf32> to vector<16x96xbf16>
    %290 = vector.extract_strided_slice %289 {offsets = [0, 0], sizes = [16, 8], strides = [1, 1]} : vector<16x96xbf16> to vector<16x8xbf16>
    %291 = vector.extract_strided_slice %289 {offsets = [0, 32], sizes = [16, 8], strides = [1, 1]} : vector<16x96xbf16> to vector<16x8xbf16>
    %cst_169 = arith.constant dense<0.000000e+00> : vector<16x16xf32>
    %292 = tpu.matmul %290, %291, %cst_169 {dimension_numbers = #tpu.dot_dimension_numbers<[1], [1], [0], [0], [0, 0, 1, 0], [], []>} : vector<16x8xbf16>, vector<16x8xbf16>, vector<16x16xf32> -> vector<16x16xf32>
    %293 = vector.extract_strided_slice %289 {offsets = [0, 8], sizes = [16, 8], strides = [1, 1]} : vector<16x96xbf16> to vector<16x8xbf16>
    %294 = vector.extract_strided_slice %289 {offsets = [0, 40], sizes = [16, 8], strides = [1, 1]} : vector<16x96xbf16> to vector<16x8xbf16>
    %cst_170 = arith.constant dense<0.000000e+00> : vector<16x16xf32>
    %295 = tpu.matmul %293, %294, %cst_170 {dimension_numbers = #tpu.dot_dimension_numbers<[1], [1], [0], [0], [0, 0, 1, 0], [], []>} : vector<16x8xbf16>, vector<16x8xbf16>, vector<16x16xf32> -> vector<16x16xf32>
    %296 = vector.extract_strided_slice %289 {offsets = [0, 16], sizes = [16, 8], strides = [1, 1]} : vector<16x96xbf16> to vector<16x8xbf16>
    %297 = vector.extract_strided_slice %289 {offsets = [0, 48], sizes = [16, 8], strides = [1, 1]} : vector<16x96xbf16> to vector<16x8xbf16>
    %cst_171 = arith.constant dense<0.000000e+00> : vector<16x16xf32>
    %298 = tpu.matmul %296, %297, %cst_171 {dimension_numbers = #tpu.dot_dimension_numbers<[1], [1], [0], [0], [0, 0, 1, 0], [], []>} : vector<16x8xbf16>, vector<16x8xbf16>, vector<16x16xf32> -> vector<16x16xf32>
    %299 = vector.extract_strided_slice %289 {offsets = [0, 24], sizes = [16, 8], strides = [1, 1]} : vector<16x96xbf16> to vector<16x8xbf16>
    %300 = vector.extract_strided_slice %289 {offsets = [0, 56], sizes = [16, 8], strides = [1, 1]} : vector<16x96xbf16> to vector<16x8xbf16>
    %cst_172 = arith.constant dense<0.000000e+00> : vector<16x16xf32>
    %301 = tpu.matmul %299, %300, %cst_172 {dimension_numbers = #tpu.dot_dimension_numbers<[1], [1], [0], [0], [0, 0, 1, 0], [], []>} : vector<16x8xbf16>, vector<16x8xbf16>, vector<16x16xf32> -> vector<16x16xf32>
    %302 = tpu.concatenate %292, %295, %298, %301 in 0 : vector<16x16xf32>, vector<16x16xf32>, vector<16x16xf32>, vector<16x16xf32> -> vector<64x16xf32>
    %303 = arith.mulf %302, %114 : vector<64x16xf32>
    %304 = arith.addf %303, %115 : vector<64x16xf32>
    %cst_173 = arith.constant dense<0xFF800000> : vector<64xf32>
    %305 = vector.multi_reduction <maximumf>, %304, %cst_173 [1] : vector<64x16xf32> to vector<64xf32>
    %306 = vector.shape_cast %305 : vector<64xf32> to vector<64x1xf32>
    %307 = vector.broadcast %306 : vector<64x1xf32> to vector<64x16xf32>
    %308 = arith.subf %304, %307 : vector<64x16xf32>
    %309 = math.exp %308 : vector<64x16xf32>
    %cst_174 = arith.constant dense<0.000000e+00> : vector<64xf32>
    %310 = vector.multi_reduction <add>, %309, %cst_174 [1] : vector<64x16xf32> to vector<64xf32>
    %311 = vector.shape_cast %310 : vector<64xf32> to vector<64x1xf32>
    %312 = tpu.reciprocal %311 {approx = true} : vector<64x1xf32> -> vector<64x1xf32>
    %313 = vector.broadcast %312 : vector<64x1xf32> to vector<64x16xf32>
    %314 = arith.mulf %309, %313 : vector<64x16xf32>
    %315 = arith.truncf %314 : vector<64x16xf32> to vector<64x16xbf16>
    %316 = vector.extract_strided_slice %315 {offsets = [0, 0], sizes = [16, 16], strides = [1, 1]} : vector<64x16xbf16> to vector<16x16xbf16>
    %317 = vector.extract_strided_slice %289 {offsets = [0, 64], sizes = [16, 8], strides = [1, 1]} : vector<16x96xbf16> to vector<16x8xbf16>
    %cst_175 = arith.constant dense<0.000000e+00> : vector<16x8xf32>
    %318 = tpu.matmul %316, %317, %cst_175 {dimension_numbers = #tpu.dot_dimension_numbers<[1], [0], [0], [1], [0, 0, 1, 1], [], []>} : vector<16x16xbf16>, vector<16x8xbf16>, vector<16x8xf32> -> vector<16x8xf32>
    %319 = vector.extract_strided_slice %315 {offsets = [16, 0], sizes = [16, 16], strides = [1, 1]} : vector<64x16xbf16> to vector<16x16xbf16>
    %320 = vector.extract_strided_slice %289 {offsets = [0, 72], sizes = [16, 8], strides = [1, 1]} : vector<16x96xbf16> to vector<16x8xbf16>
    %cst_176 = arith.constant dense<0.000000e+00> : vector<16x8xf32>
    %321 = tpu.matmul %319, %320, %cst_176 {dimension_numbers = #tpu.dot_dimension_numbers<[1], [0], [0], [1], [0, 0, 1, 1], [], []>} : vector<16x16xbf16>, vector<16x8xbf16>, vector<16x8xf32> -> vector<16x8xf32>
    %322 = vector.extract_strided_slice %315 {offsets = [32, 0], sizes = [16, 16], strides = [1, 1]} : vector<64x16xbf16> to vector<16x16xbf16>
    %323 = vector.extract_strided_slice %289 {offsets = [0, 80], sizes = [16, 8], strides = [1, 1]} : vector<16x96xbf16> to vector<16x8xbf16>
    %cst_177 = arith.constant dense<0.000000e+00> : vector<16x8xf32>
    %324 = tpu.matmul %322, %323, %cst_177 {dimension_numbers = #tpu.dot_dimension_numbers<[1], [0], [0], [1], [0, 0, 1, 1], [], []>} : vector<16x16xbf16>, vector<16x8xbf16>, vector<16x8xf32> -> vector<16x8xf32>
    %325 = vector.extract_strided_slice %315 {offsets = [48, 0], sizes = [16, 16], strides = [1, 1]} : vector<64x16xbf16> to vector<16x16xbf16>
    %326 = vector.extract_strided_slice %289 {offsets = [0, 88], sizes = [16, 8], strides = [1, 1]} : vector<16x96xbf16> to vector<16x8xbf16>
    %cst_178 = arith.constant dense<0.000000e+00> : vector<16x8xf32>
    %327 = tpu.matmul %325, %326, %cst_178 {dimension_numbers = #tpu.dot_dimension_numbers<[1], [0], [0], [1], [0, 0, 1, 1], [], []>} : vector<16x16xbf16>, vector<16x8xbf16>, vector<16x8xf32> -> vector<16x8xf32>
    %328 = tpu.concatenate %318, %321, %324, %327 in 1 : vector<16x8xf32>, vector<16x8xf32>, vector<16x8xf32>, vector<16x8xf32> -> vector<16x32xf32>
    %329 = arith.truncf %328 : vector<16x32xf32> to vector<16x32xbf16>
    %c1_179 = arith.constant 1 : index
    %c0_180 = arith.constant 0 : index
    %c0_181 = arith.constant 0 : index
    %330 = vector.load %arg7[%c1_179, %c0_180, %c0_181] : memref<2x32x32xbf16, #tpu.memory_space<vmem>>, vector<1x32x32xbf16>
    %331 = vector.shape_cast %330 : vector<1x32x32xbf16> to vector<32x32xbf16>
    %cst_182 = arith.constant dense<0.000000e+00> : vector<16x32xf32>
    %332 = tpu.matmul %329, %331, %cst_182 {dimension_numbers = #tpu.dot_dimension_numbers<[1], [0], [0], [1], [0, 0, 1, 1], [], []>} : vector<16x32xbf16>, vector<32x32xbf16>, vector<16x32xf32> -> vector<16x32xf32>
    %c1_183 = arith.constant 1 : index
    %c0_184 = arith.constant 0 : index
    %c0_185 = arith.constant 0 : index
    %333 = vector.load %arg8[%c1_183, %c0_184, %c0_185] : memref<2x1x32xf32, #tpu.memory_space<vmem>>, vector<1x1x32xf32>
    %334 = vector.shape_cast %333 : vector<1x1x32xf32> to vector<1x32xf32>
    %335 = vector.broadcast %334 : vector<1x32xf32> to vector<16x32xf32>
    %336 = arith.addf %332, %335 : vector<16x32xf32>
    %337 = arith.addf %254, %336 : vector<16x32xf32>
    %c1_186 = arith.constant 1 : index
    %c0_187 = arith.constant 0 : index
    %c0_188 = arith.constant 0 : index
    %338 = vector.load %arg9[%c1_186, %c0_187, %c0_188] : memref<2x1x32xf32, #tpu.memory_space<vmem>>, vector<1x1x32xf32>
    %339 = vector.shape_cast %338 : vector<1x1x32xf32> to vector<1x32xf32>
    %c1_189 = arith.constant 1 : index
    %c0_190 = arith.constant 0 : index
    %c0_191 = arith.constant 0 : index
    %340 = vector.load %arg10[%c1_189, %c0_190, %c0_191] : memref<2x1x32xf32, #tpu.memory_space<vmem>>, vector<1x1x32xf32>
    %341 = vector.shape_cast %340 : vector<1x1x32xf32> to vector<1x32xf32>
    %cst_192 = arith.constant dense<0.000000e+00> : vector<16xf32>
    %342 = vector.multi_reduction <add>, %337, %cst_192 [1] : vector<16x32xf32> to vector<16xf32>
    %343 = vector.shape_cast %342 : vector<16xf32> to vector<16x1xf32>
    %cst_193 = arith.constant 3.200000e+01 : f32
    %344 = vector.broadcast %cst_193 : f32 to vector<16x1xf32>
    %345 = arith.divf %343, %344 : vector<16x1xf32>
    %346 = vector.broadcast %345 : vector<16x1xf32> to vector<16x32xf32>
    %347 = arith.subf %337, %346 : vector<16x32xf32>
    %348 = arith.mulf %347, %347 : vector<16x32xf32>
    %cst_194 = arith.constant dense<0.000000e+00> : vector<16xf32>
    %349 = vector.multi_reduction <add>, %348, %cst_194 [1] : vector<16x32xf32> to vector<16xf32>
    %350 = vector.shape_cast %349 : vector<16xf32> to vector<16x1xf32>
    %cst_195 = arith.constant 3.200000e+01 : f32
    %351 = vector.broadcast %cst_195 : f32 to vector<16x1xf32>
    %352 = arith.divf %350, %351 : vector<16x1xf32>
    %353 = vector.broadcast %345 : vector<16x1xf32> to vector<16x32xf32>
    %354 = arith.subf %337, %353 : vector<16x32xf32>
    %cst_196 = arith.constant 9.99999974E-6 : f32
    %355 = vector.broadcast %cst_196 : f32 to vector<16x1xf32>
    %356 = arith.addf %352, %355 : vector<16x1xf32>
    %357 = math.rsqrt %356 : vector<16x1xf32>
    %358 = vector.broadcast %357 : vector<16x1xf32> to vector<16x32xf32>
    %359 = arith.mulf %354, %358 : vector<16x32xf32>
    %360 = vector.broadcast %339 : vector<1x32xf32> to vector<16x32xf32>
    %361 = arith.mulf %359, %360 : vector<16x32xf32>
    %362 = vector.broadcast %341 : vector<1x32xf32> to vector<16x32xf32>
    %363 = arith.addf %361, %362 : vector<16x32xf32>
    %364 = arith.truncf %363 : vector<16x32xf32> to vector<16x32xbf16>
    %c1_197 = arith.constant 1 : index
    %c0_198 = arith.constant 0 : index
    %c0_199 = arith.constant 0 : index
    %365 = vector.load %arg11[%c1_197, %c0_198, %c0_199] : memref<2x32x128xbf16, #tpu.memory_space<vmem>>, vector<1x32x128xbf16>
    %366 = vector.shape_cast %365 : vector<1x32x128xbf16> to vector<32x128xbf16>
    %cst_200 = arith.constant dense<0.000000e+00> : vector<16x128xf32>
    %367 = tpu.matmul %364, %366, %cst_200 {dimension_numbers = #tpu.dot_dimension_numbers<[1], [0], [0], [1], [0, 0, 1, 1], [], []>} : vector<16x32xbf16>, vector<32x128xbf16>, vector<16x128xf32> -> vector<16x128xf32>
    %c1_201 = arith.constant 1 : index
    %c0_202 = arith.constant 0 : index
    %c0_203 = arith.constant 0 : index
    %368 = vector.load %arg12[%c1_201, %c0_202, %c0_203] : memref<2x1x128xf32, #tpu.memory_space<vmem>>, vector<1x1x128xf32>
    %369 = vector.shape_cast %368 : vector<1x1x128xf32> to vector<1x128xf32>
    %370 = vector.broadcast %369 : vector<1x128xf32> to vector<16x128xf32>
    %371 = arith.addf %367, %370 : vector<16x128xf32>
    %cst_204 = arith.constant 5.000000e-01 : f32
    %372 = vector.broadcast %cst_204 : f32 to vector<16x128xf32>
    %373 = arith.mulf %372, %371 : vector<16x128xf32>
    %cst_205 = arith.constant 4.471500e-02 : f32
    %374 = vector.broadcast %cst_205 : f32 to vector<16x128xf32>
    %375 = arith.mulf %374, %371 : vector<16x128xf32>
    %376 = arith.mulf %375, %371 : vector<16x128xf32>
    %377 = arith.mulf %376, %371 : vector<16x128xf32>
    %378 = arith.addf %371, %377 : vector<16x128xf32>
    %cst_206 = arith.constant 0.797884583 : f32
    %379 = vector.broadcast %cst_206 : f32 to vector<16x128xf32>
    %380 = arith.mulf %379, %378 : vector<16x128xf32>
    %381 = math.tanh %380 : vector<16x128xf32>
    %cst_207 = arith.constant 1.000000e+00 : f32
    %382 = vector.broadcast %cst_207 : f32 to vector<16x128xf32>
    %383 = arith.addf %382, %381 : vector<16x128xf32>
    %384 = arith.mulf %373, %383 : vector<16x128xf32>
    %385 = arith.truncf %384 : vector<16x128xf32> to vector<16x128xbf16>
    %c1_208 = arith.constant 1 : index
    %c0_209 = arith.constant 0 : index
    %c0_210 = arith.constant 0 : index
    %386 = vector.load %arg13[%c1_208, %c0_209, %c0_210] : memref<2x128x32xbf16, #tpu.memory_space<vmem>>, vector<1x128x32xbf16>
    %387 = vector.shape_cast %386 : vector<1x128x32xbf16> to vector<128x32xbf16>
    %cst_211 = arith.constant dense<0.000000e+00> : vector<16x32xf32>
    %388 = tpu.matmul %385, %387, %cst_211 {dimension_numbers = #tpu.dot_dimension_numbers<[1], [0], [0], [1], [0, 0, 1, 1], [], []>} : vector<16x128xbf16>, vector<128x32xbf16>, vector<16x32xf32> -> vector<16x32xf32>
    %c1_212 = arith.constant 1 : index
    %c0_213 = arith.constant 0 : index
    %c0_214 = arith.constant 0 : index
    %389 = vector.load %arg14[%c1_212, %c0_213, %c0_214] : memref<2x1x32xf32, #tpu.memory_space<vmem>>, vector<1x1x32xf32>
    %390 = vector.shape_cast %389 : vector<1x1x32xf32> to vector<1x32xf32>
    %391 = vector.broadcast %390 : vector<1x32xf32> to vector<16x32xf32>
    %392 = arith.addf %388, %391 : vector<16x32xf32>
    %393 = arith.addf %337, %392 : vector<16x32xf32>
    %c0_215 = arith.constant 0 : index
    %c0_216 = arith.constant 0 : index
    %394 = vector.load %arg15[%c0_215, %c0_216] : memref<1x32xf32, #tpu.memory_space<vmem>>, vector<1x32xf32>
    %c0_217 = arith.constant 0 : index
    %c0_218 = arith.constant 0 : index
    %395 = vector.load %arg16[%c0_217, %c0_218] : memref<1x32xf32, #tpu.memory_space<vmem>>, vector<1x32xf32>
    %cst_219 = arith.constant dense<0.000000e+00> : vector<16xf32>
    %396 = vector.multi_reduction <add>, %393, %cst_219 [1] : vector<16x32xf32> to vector<16xf32>
    %397 = vector.shape_cast %396 : vector<16xf32> to vector<16x1xf32>
    %cst_220 = arith.constant 3.200000e+01 : f32
    %398 = vector.broadcast %cst_220 : f32 to vector<16x1xf32>
    %399 = arith.divf %397, %398 : vector<16x1xf32>
    %400 = vector.broadcast %399 : vector<16x1xf32> to vector<16x32xf32>
    %401 = arith.subf %393, %400 : vector<16x32xf32>
    %402 = arith.mulf %401, %401 : vector<16x32xf32>
    %cst_221 = arith.constant dense<0.000000e+00> : vector<16xf32>
    %403 = vector.multi_reduction <add>, %402, %cst_221 [1] : vector<16x32xf32> to vector<16xf32>
    %404 = vector.shape_cast %403 : vector<16xf32> to vector<16x1xf32>
    %cst_222 = arith.constant 3.200000e+01 : f32
    %405 = vector.broadcast %cst_222 : f32 to vector<16x1xf32>
    %406 = arith.divf %404, %405 : vector<16x1xf32>
    %407 = vector.broadcast %399 : vector<16x1xf32> to vector<16x32xf32>
    %408 = arith.subf %393, %407 : vector<16x32xf32>
    %cst_223 = arith.constant 9.99999974E-6 : f32
    %409 = vector.broadcast %cst_223 : f32 to vector<16x1xf32>
    %410 = arith.addf %406, %409 : vector<16x1xf32>
    %411 = math.rsqrt %410 : vector<16x1xf32>
    %412 = vector.broadcast %411 : vector<16x1xf32> to vector<16x32xf32>
    %413 = arith.mulf %408, %412 : vector<16x32xf32>
    %414 = vector.broadcast %394 : vector<1x32xf32> to vector<16x32xf32>
    %415 = arith.mulf %413, %414 : vector<16x32xf32>
    %416 = vector.broadcast %395 : vector<1x32xf32> to vector<16x32xf32>
    %417 = arith.addf %415, %416 : vector<16x32xf32>
    %418 = arith.truncf %417 : vector<16x32xf32> to vector<16x32xbf16>
    %c0_224 = arith.constant 0 : index
    %c0_225 = arith.constant 0 : index
    %419 = vector.load %arg17[%c0_224, %c0_225] : memref<32x128xbf16, #tpu.memory_space<vmem>>, vector<32x128xbf16>
    %cst_226 = arith.constant dense<0.000000e+00> : vector<16x128xf32>
    %420 = tpu.matmul %418, %419, %cst_226 {dimension_numbers = #tpu.dot_dimension_numbers<[1], [0], [0], [1], [0, 0, 1, 1], [], []>} : vector<16x32xbf16>, vector<32x128xbf16>, vector<16x128xf32> -> vector<16x128xf32>
    %c0_227 = arith.constant 0 : index
    %c0_228 = arith.constant 0 : index
    %421 = vector.load %arg18[%c0_227, %c0_228] : memref<16x128xf32, #tpu.memory_space<vmem>>, vector<16x128xf32>
    tpu.vector_store %arg18[%c0_227, %c0_228], %420 {strides = array<i32>} : memref<16x128xf32, #tpu.memory_space<vmem>>, vector<16x128xf32>,
    return
  }
}

</mosaic_0001>

<bundles_post_ra>
// kernel: gpt_forward.1
= control target key start
LH: loop header
LB: loop body
LE: loop exit
PB: predicated region body
PF: predicated region fallthrough
CT: control target
= control target key end

     0   :  { %s3611_s0 = inlined_call_operand.vmem [shape: s32[16], index: 0, kind: input, shape index: {}]   ;;  %s3612_s1 = inlined_call_operand.vmem [shape: f32[65,32], index: 1, kind: input, shape index: {}]   ;;  %s3613_s2 = inlined_call_operand.vmem [shape: f32[64,32], index: 2, kind: input, shape index: {}]   ;;  %s3614_s3 = inlined_call_operand.vmem [shape: f32[2,1,32], index: 3, kind: input, shape index: {}]   ;;  %s3615_s4 = inlined_call_operand.vmem [shape: f32[2,1,32], index: 4, kind: input, shape index: {}]   ;;  %s3616_s5 = inlined_call_operand.vmem [shape: bf16[2,32,96], index: 5, kind: input, shape index: {}]   ;;  %s3617_s6 = inlined_call_operand.vmem [shape: f32[2,1,96], index: 6, kind: input, shape index: {}]   ;;  %s3618_s7 = inlined_call_operand.vmem [shape: bf16[2,32,32], index: 7, kind: input, shape index: {}]   ;;  %s3619_s8 = inlined_call_operand.vmem [shape: f32[2,1,32], index: 8, kind: input, shape index: {}]   ;;  %s3620_s9 = inlined_call_operand.vmem [shape: f32[2,1,32], index: 9, kind: input, shape index: {}]   ;;  %s3621_s10 = inlined_call_operand.vmem [shape: f32[2,1,32], index: 10, kind: input, shape index: {}]   ;;  %s3622_s11 = inlined_call_operand.vmem [shape: bf16[2,32,128], index: 11, kind: input, shape index: {}]   ;;  %s3623_s12 = inlined_call_operand.vmem [shape: f32[2,1,128], index: 12, kind: input, shape index: {}]   ;;  %s3624_s13 = inlined_call_operand.vmem [shape: bf16[2,128,32], index: 13, kind: input, shape index: {}]   ;;  %s3625_s14 = inlined_call_operand.vmem [shape: f32[2,1,32], index: 14, kind: input, shape index: {}]   ;;  %s3626_s15 = inlined_call_operand.vmem [shape: f32[1,32], index: 15, kind: input, shape index: {}]   ;;  %s3627_s16 = inlined_call_operand.vmem [shape: f32[1,32], index: 16, kind: input, shape index: {}]   ;;  %s3628_s17 = inlined_call_operand.vmem [shape: bf16[32,128], index: 17, kind: input, shape index: {}]   ;;  %s3629_s18 = inlined_call_operand.hbm [shape: f32[16,128], index: 18, kind: output, shape index: {}]  }
   0x1   :  { %3639 = sst [smem:[#allocation9_spill]] %s3611_s0 }
   0x2   :  { %3640 = sst [smem:[#allocation10_spill]] %s3612_s1 }
   0x3   :  { %3641 = sst [smem:[#allocation11_spill]] %s3613_s2 }
   0x4   :  { %3642 = sst [smem:[#allocation12_spill]] %s3621_s10 }
   0x5   :  { %3643 = sst [smem:[#allocation13_spill]] %s3623_s12 }
   0x6   :  { %3644 = sst [smem:[#allocation14_spill]] %s3624_s13 }
   0x7   :  { %3645 = sst [smem:[#allocation15_spill]] %s3625_s14 }
   0x8   :  { %3646 = sst [smem:[#allocation16_spill]] %s3626_s15 }
   0x9   :  { %3647 = sst [smem:[#allocation17_spill]] %s3627_s16 }
   0xa   :  { %3648 = sst [smem:[#allocation18_spill]] %s3628_s17 }
   0xb   :  { %3649 = sst [smem:[#allocation19_spill]] %s3629_s18 }
   0xc   :  { %23 = vsyncpa [#allocation5], 0 }
   0xd   :  { %24 = vsyncpa [#allocation4], 0  ;;  %s3650_s29 = sld [smem:[#allocation9_spill]] }
  0x13   :  { %s31_s30 = sshll.u32 %s3650_s29, 4  ;;  %s32_s30 = int_to_ptr.vmem [resolvable:$true] %s31_s30 }
  0x14   :  { %s2821_s0 = scalar_lea.vmem %s32_s30, 16  ;;  %p2826_p1 = scmp.lt.s32.totalorder %s32_s30, %s32_s30 }
  0x15   :  { %p2822_p0 = scmp.ne.s32.totalorder %s32_s30, %s2821_s0  ;;  %p2827_p2 = scmp.lt.s32.totalorder %s2821_s0, %s2821_s0 }
  0x17   :  { %p2828_p3 = por %p2827_p2, %p2826_p1 }
  0x19   :  { %p2829_p4 = pnand %p2828_p3, %p2822_p0 }
  0x1b   :  { %2832 = shalt.err (!%p2829_p4)
}
  0x1c   :  { %s2859_s19 = smov [#allocation3]  }
  0x1d   :  { %34 = dma.vmem_to_smem %s32_s30, 16, %s2859_s19, [#allocation5]  }
  0x1e   :  { %2855 = dma.done.wait [#allocation5], 16  }
  0x1f   :  { %2856 = vsyncadd [#allocation5], 4294967280 }
  0x20   :  { %72 = sfence }
  0x21   :  { %s74_s1 = sld [smem:[#allocation3]]  ;;  %s2264_s20 = sld [smem:[#allocation3 + $0x1]]  ;;  %vm79_vm0 = vcmask 253952   ;;  %vm195_vm1 = vcmask 261120   ;;  %v2699_v62 = vld [vmem:[%s3616_s5] sm:$0xff]   ;;  %v2860_v63 = vmov 0.0  }
  0x22   :  { %s2265_s21 = sld [smem:[#allocation3 + $0x2]]  ;;  %s2266_s22 = sld [smem:[#allocation3 + $0x3]]  ;;  %2457 = vmatprep.subr.bf16.mxu1 %v2860_v63  ;;  %2471 = vmatprep.subr.bf16.mxu0 %v2860_v63  ;;  %vm2861_vm2 = vmmov 0   ;;  %vm311_vm3 = vcmask 64512   ;;  %vm528_vm10 = vcmask 130048   ;;  %vm837_vm11 = vcmask 195584  }
  0x23   :  { %s3651_s24 = sld [smem:[#allocation11_spill]]  ;;  %s2980_s25 = sld [smem:[#allocation3 + $0x4]]  ;;  %2458 = vmatpush3.bf16.msra.mxu1 %v2699_v62  ;;  %2461 = vmatprep.mubr.msk.bf16.mxu1 %vm2861_vm2, %v2860_v63 }
  0x24   :  { %s2982_s26 = sld [smem:[#allocation3 + $0x5]]  ;;  %s2987_s29 = sld [smem:[#allocation3 + $0x6]]  ;;  %2459 = vmatprep.subr.bf16.mxu1 %v2860_v63  ;;  %2473 = vmatprep.mubr.msk.bf16.mxu0 %vm2861_vm2, %v2860_v63 }
  0x25   :  { %s2992_s19 = sld [smem:[#allocation3 + $0x7]]  ;;  %s2994_s18 = sld [smem:[#allocation3 + $0x8]] }
  0x26   :  { %s3652_s16 = sld [smem:[#allocation10_spill]]  ;;  %s3005_s30 = sld [smem:[#allocation3 + $0x9]] }
  0x27   :  { %s3043_s28 = sld [smem:[#allocation3 + $0xb]]  ;;  %s2863_s17 = smov 96  }
  0x28   :  { %s2864_s27 = smov 80   ;;  %s3656_s14 = sld [smem:[#allocation14_spill]] }
  0x29   :  { %v77_v0 = vld [vmem:[%s3651_s24] sm:$0x1]  ;;  %v84_v1 = vld [vmem:[%s3651_s24 + $0x1] sm:$0x1]  ;;  %v90_v2 = vld [vmem:[%s3651_s24 + $0x2] sm:$0x1] }
  0x2a   :  { %v96_v3 = vld [vmem:[%s3651_s24 + $0x3] sm:$0x1]  ;;  %v102_v4 = vld [vmem:[%s3651_s24 + $0x4] sm:$0x1]  ;;  %v108_v6 = vld [vmem:[%s3651_s24 + $0x5] sm:$0x1] }
  0x2b   :  { %v114_v7 = vld [vmem:[%s3651_s24 + $0x6] sm:$0x1]  ;;  %v120_v14 = vld [vmem:[%s3651_s24 + $0x7] sm:$0x1]  ;;  %v126_v15 = vld [vmem:[%s3651_s24] sm:$0x1] }
  0x2c   :  { %s75_s15 = scalar_lea.vmem %s3652_s16, %s74_s1  ;;  %s82_s13 = scalar_lea.vmem %s3652_s16, %s2264_s20  ;;  %v132_v22 = vld [vmem:[%s3651_s24 + $0x1] sm:$0x1]  ;;  %v138_v23 = vld [vmem:[%s3651_s24 + $0x2] sm:$0x1]  ;;  %v144_v30 = vld [vmem:[%s3651_s24 + $0x3] sm:$0x1] }
  0x2d   :  { %v76_v5 = vld [vmem:[%s75_s15] sm:$0x1]  ;;  %s88_s1 = scalar_lea.vmem %s3652_s16, %s2265_s21  ;;  %s94_s12 = scalar_lea.vmem %s3652_s16, %s2266_s22  ;;  %v150_v33 = vld [vmem:[%s3651_s24 + $0x4] sm:$0x1]  ;;  %v156_v35 = vld [vmem:[%s3651_s24 + $0x5] sm:$0x1] }
  0x2e   :  { %v78_v8 = vadd.f32 %v77_v0, %v76_v5  ;;  %v83_v9 = vld [vmem:[%s82_s13] sm:$0x1]  ;;  %s3022_s20 = sld [smem:[#allocation3 + $0xa]]  ;;  %s100_s0 = scalar_lea.vmem %s3652_s16, %s2980_s25  ;;  %v162_v36 = vld [vmem:[%s3651_s24 + $0x6] sm:$0x1]  ;;  %v2700_v0 = vld [vmem:[%s3616_s5 + $0x8] sm:$0xff]  }
  0x2f   :  { %v89_v10 = vld [vmem:[%s88_s1] sm:$0x1]  ;;  %v85_v11 = vadd.f32 %v84_v1, %v83_v9  ;;  %s106_s13 = scalar_lea.vmem %s3652_s16, %s2982_s26  ;;  %s112_s15 = scalar_lea.vmem %s3652_s16, %s2987_s29  ;;  %v168_v38 = vld [vmem:[%s3651_s24 + $0x7] sm:$0x1]  ;;  %2460 = vmatpush3.bf16.msra.mxu1 %v2700_v0 }
  0x30   :  { %v91_v12 = vadd.f32 %v90_v2, %v89_v10  ;;  %v95_v13 = vld [vmem:[%s94_s12] sm:$0x1]  ;;  %80 = vst.msk [vmem:[#allocation2] sm:$0x1] %vm79_vm0, %v78_v8  ;;  %s118_s10 = scalar_lea.vmem %s3652_s16, %s2992_s19  ;;  %s124_s2 = scalar_lea.vmem %s3652_s16, %s2994_s18  ;;  %2465 = vmatprep.subr.bf16.mxu1 %v2860_v63 }
  0x31   :  { %v97_v16 = vadd.f32 %v96_v3, %v95_v13  ;;  %v101_v17 = vld [vmem:[%s100_s0] sm:$0x1]  ;;  %86 = vst.msk [vmem:[#allocation2 + $0x1] sm:$0x1] %vm79_vm0, %v85_v11  ;;  %s130_s22 = scalar_lea.vmem %s3652_s16, %s3005_s30  ;;  %s2275_s18 = sld [smem:[#allocation3 + $0xc]] }
  0x32   :  { %v107_v18 = vld [vmem:[%s106_s13] sm:$0x1]  ;;  %92 = vst.msk [vmem:[#allocation2 + $0x2] sm:$0x1] %vm79_vm0, %v91_v12  ;;  %v103_v19 = vadd.f32 %v102_v4, %v101_v17  ;;  %s2276_s25 = sld [smem:[#allocation3 + $0xd]]  ;;  %s142_s29 = scalar_lea.vmem %s3652_s16, %s3043_s28 }
  0x33   :  { %v109_v20 = vadd.f32 %v108_v6, %v107_v18  ;;  %v113_v21 = vld [vmem:[%s112_s15] sm:$0x1]  ;;  %98 = vst.msk [vmem:[#allocation2 + $0x3] sm:$0x1] %vm79_vm0, %v97_v16  ;;  %s2277_s15 = sld [smem:[#allocation3 + $0xe]]  ;;  %s2866_s26 = smov 120  }
  0x34   :  { %v115_v24 = vadd.f32 %v114_v7, %v113_v21  ;;  %v119_v25 = vld [vmem:[%s118_s10] sm:$0x1]  ;;  %104 = vst.msk [vmem:[#allocation2 + $0x4] sm:$0x1] %vm79_vm0, %v103_v19  ;;  %s136_s12 = scalar_lea.vmem %s3652_s16, %s3022_s20  ;;  %s2278_s10 = sld [smem:[#allocation3 + $0xf]] }
  0x35   :  { %v125_v26 = vld [vmem:[%s124_s2] sm:$0x1]  ;;  %110 = vst.msk [vmem:[#allocation2 + $0x5] sm:$0x1] %vm79_vm0, %v109_v20  ;;  %v121_v27 = vadd.f32 %v120_v14, %v119_v25  ;;  %s2867_s30 = smov 104   ;;  %s2870_s21 = smov 64  }
  0x36   :  { %v127_v28 = vadd.f32 %v126_v15, %v125_v26  ;;  %v131_v29 = vld [vmem:[%s130_s22] sm:$0x1]  ;;  %116 = vst.msk [vmem:[#allocation2 + $0x6] sm:$0x1] %vm79_vm0, %v115_v24  ;;  %s2862_s22 = smov 88   ;;  %s2871_s0 = smov 48  }
  0x37   :  { %v133_v31 = vadd.f32 %v132_v22, %v131_v29  ;;  %122 = vst.msk [vmem:[#allocation2 + $0x7] sm:$0x1] %vm79_vm0, %v121_v27  ;;  %v137_v32 = vld [vmem:[%s136_s12] sm:$0x1]  ;;  %s148_s28 = scalar_lea.vmem %s3652_s16, %s2275_s18  ;;  %s2873_s24 = smov 56  }
  0x38   :  { %128 = vst.msk [vmem:[#allocation2 + $0x8] sm:$0x1] %vm79_vm0, %v127_v28  ;;  %v139_v34 = vadd.f32 %v138_v23, %v137_v32  ;;  %v143_v37 = vld [vmem:[%s142_s29] sm:$0x1]  ;;  %s154_s12 = scalar_lea.vmem %s3652_s16, %s2276_s25  ;;  %s2874_s25 = smov 8  }
  0x39   :  { %134 = vst.msk [vmem:[#allocation2 + $0x9] sm:$0x1] %vm79_vm0, %v133_v31  ;;  %v145_v39 = vadd.f32 %v144_v30, %v143_v37  ;;  %v149_v40 = vld [vmem:[%s148_s28] sm:$0x1]  ;;  %s160_s2 = scalar_lea.vmem %s3652_s16, %s2277_s15  ;;  %s2865_s28 = smov 72   ;;  %v173_v37 = vlaneseq }
  0x3a   :  { %140 = vst.msk [vmem:[#allocation2 + $0xa] sm:$0x1] %vm79_vm0, %v139_v34  ;;  %v151_v41 = vadd.f32 %v150_v33, %v149_v40  ;;  %v155_v42 = vld [vmem:[%s154_s12] sm:$0x1]  ;;  %s166_s29 = scalar_lea.vmem %s3652_s16, %s2278_s10  ;;  %s2868_s12 = smov 112  }
  0x3b   :  { %146 = vst.msk [vmem:[#allocation2 + $0xb] sm:$0x1] %vm79_vm0, %v145_v39  ;;  %v161_v43 = vld [vmem:[%s160_s2] sm:$0x1]  ;;  %v157_v44 = vadd.f32 %v156_v35, %v155_v42  ;;  %v177_v39 = vand.u32 127, %v173_v37  ;;  %s2872_s2 = smov 40  }
  0x3c   :  { %v163_v45 = vadd.f32 %v162_v36, %v161_v43  ;;  %v167_v46 = vld [vmem:[%s166_s29] sm:$0x1]  ;;  %152 = vst.msk [vmem:[#allocation2 + $0xc] sm:$0x1] %vm79_vm0, %v151_v41  ;;  %s2875_s15 = smov 16   ;;  %s3638_s10 = smov 24  }
  0x3d   :  { %v169_v48 = vadd.f32 %v168_v38, %v167_v46  ;;  %158 = vst.msk [vmem:[#allocation2 + $0xd] sm:$0x1] %vm79_vm0, %v157_v44  ;;  %v2279_v9 = vld [vmem:[%s3614_s3] ss:$0 sm:$0xff]  ;;  %v174_v38 = vshrl.u32 %v173_v37, 7  ;;  %v180_v42 = vshrl.u32 %v177_v39, 3 }
  0x3e   :  { %v3109_v47 = vld [vmem:[#allocation2] sm:$0xff]  ;;  %164 = vst.msk [vmem:[#allocation2 + $0xe] sm:$0x1] %vm79_vm0, %v163_v45  ;;  %v2280_v13 = vld [vmem:[%s3615_s4] ss:$0 sm:$0xff]  ;;  %s3655_s1 = sld [smem:[#allocation12_spill]] }
  0x3f   :  { %v196_v49 = vsel %vm195_vm1, %v3109_v47, 0.0  ;;  %170 = vst.msk [vmem:[#allocation2 + $0xf] sm:$0x1] %vm79_vm0, %v169_v48  ;;  %v2281_v18 = vld [vmem:[%s3617_s6] ss:$0 sm:$0xff]  ;;  %v175_v40 = vadd.s32 8, %v174_v38  ;;  %vm183_vm5 = vcmp.le.s32.totalorder %v177_v39, %v174_v38 }
  0x40   :  { %197 = vadd.xlane.f32.xlu0 %v196_v49  ;;  %v178_v41 = vshrl.u32 %v174_v38, 3  ;;  %v2869_v45 = vmov -1e+30   ;;  %s3657_s23 = sld [smem:[#allocation13_spill]]  ;;  %s3658_s18 = sld [smem:[#allocation15_spill]] }
  0x41   :  { %v179_v43 = vshrl.u32 %v175_v40, 3  ;;  %vm184_vm7 = vcmp.le.s32.totalorder %v177_v39, %v175_v40 }
  0x42   :  { %vm181_vm4 = vcmp.eq.s32.totalorder %v178_v41, %v180_v42 }
  0x43   :  { %vm182_vm6 = vcmp.eq.s32.totalorder %v179_v43, %v180_v42  ;;  %vm185_vm8 = vmand %vm181_vm4, %vm183_vm5  ;;  %v189_v46 = vsel %vm181_vm4, -20.0, %v2869_v45 }
  0x44   :  { %vm3188_vm9 = vmand %vm182_vm6, %vm184_vm7  ;;  %v3193_v48 = vsel %vm185_vm8, 0.35355338, %v2860_v63  ;;  %v190_v49 = vsel %vm182_vm6, -20.0, %v2869_v45 }
  0x46   :  { %v3117_v50 = vld [vmem:[#allocation2 + $0x8] sm:$0xff] }
  0x47   :  { %v199_v51 = vsel %vm195_vm1, %v3117_v50, 0.0 }
  0x48   :  { %200 = vadd.xlane.f32.xlu0 %v199_v51 }
  0xcd   :  { %v198_v52 = vpop.xlane.xlu0 %197 }
  0xce   :  { %v203_v53 = vmul.f32 0.03125, %v198_v52 }
  0xd0   :  { %v205_v54 = vsub.f32 %v3109_v47, %v203_v53  ;;  %v3198_v53 = vsel %vm3188_vm9, 0.35355338, %v2860_v63 }
  0xd2   :  { %v207_v55 = vmul.f32 %v205_v54, %v205_v54 }
  0xd4   :  { %v209_v56 = vsel %vm195_vm1, %v207_v55, 0.0 }
  0xd5   :  { %210 = vadd.xlane.f32.xlu1 %v209_v56  ;;  %v201_v57 = vpop.xlane.xlu0 %200 }
  0xd6   :  { %v204_v58 = vmul.f32 0.03125, %v201_v57 }
  0xd8   :  { %v206_v59 = vsub.f32 %v3117_v50, %v204_v58 }
  0xda   :  { %v208_v60 = vmul.f32 %v206_v59, %v206_v59 }
  0xdc   :  { %v212_v61 = vsel %vm195_vm1, %v208_v60, 0.0 }
  0xdd   :  { %213 = vadd.xlane.f32.xlu1 %v212_v61  ;;  %v3206_v61 = vsel %vm3188_vm9, 0.0, %v190_v49 }
 0x162   :  { %v211_v1 = vpop.xlane.xlu1 %210 }
 0x163   :  { %v215_v2 = vmul.f32 0.03125, %v211_v1 }
 0x165   :  { %v217_v3 = vadd.f32 1e-05, %v215_v2 }
 0x167   :  { %2729 = vrsqrt.f32 %v217_v3 }
 0x16a   :  { %v214_v4 = vpop.xlane.xlu1 %213 }
 0x16b   :  { %v216_v5 = vmul.f32 0.03125, %v214_v4 }
 0x16d   :  { %v218_v6 = vadd.f32 1e-05, %v216_v5 }
 0x16f   :  { %2731 = vrsqrt.f32 %v218_v6 }
 0x171   :  { %v2730_v7 = vpop.eup %2729 }
 0x172   :  { %v221_v8 = vmul.f32 %v2730_v7, %v205_v54  ;;  %v3200_v54 = vsel %vm185_vm8, 0.0, %v189_v46 }
 0x174   :  { %v229_v12 = vmul.f32 %v2279_v9, %v221_v8 }
 0x176   :  { %v237_v15 = vadd.f32 %v2280_v13, %v229_v12 }
 0x179   :  { %v2732_v10 = vpop.eup %2731 }
 0x17a   :  { %v222_v11 = vmul.f32 %v2732_v10, %v206_v59 }
 0x17c   :  { %v230_v14 = vmul.f32 %v2279_v9, %v222_v11 }
 0x17e   :  { %v238_v16 = vadd.f32 %v2280_v13, %v230_v14 }
 0x180   :  { %v239_v17 = vpack.c.bf16 %v238_v16, %v237_v15 }
 0x182   :  { %2462 = vmatmul.mubr.msk.bf16.vlgmr.msra.gmra.mrb[0].mxu1 %vm195_vm1, %v239_v17 }
 0x183   :  { %2467 = vmatprep.mubr.msk.bf16.mxu1 %vm2861_vm2, %v2860_v63 }
 0x255   :  { %v300_v19 = vpop.f32.mrb[0].mxu1 }
 0x256   :  { %v2463_v20 = vpop.f32.mrb[1].mxu1  ;;  %v301_v22 = vadd.f32 %v2281_v18, %v300_v19 }
 0x257   :  { %v303_v21 = vpop.f32.mrb[2].mxu1 }
 0x258   :  { %v304_v23 = vadd.f32 %v2281_v18, %v303_v21  ;;  %v2464_v24 = vpop.f32.mrb[3].mxu1 }
 0x25a   :  { %v3151_v25 = vpack.c.bf16 %v304_v23, %v301_v22 }
 0x25c   :  { %361 = vrot.lane.b32.xlu1 %v3151_v25, %s2862_s22  ;;  %309 = vrot.lane.b32.xlu0 %v3151_v25, %s2863_s17 }
 0x260   :  { %412 = vrot.lane.b32.xlu1 %v3151_v25, %s2864_s27  ;;  %463 = vrot.lane.b32.xlu0 %v3151_v25, %s2865_s28 }
 0x264   :  { %359 = vrot.lane.b32.xlu1 %v3151_v25, %s2866_s26  ;;  %461 = vrot.lane.b32.xlu0 %v3151_v25, %s2867_s30 }
 0x268   :  { %410 = vrot.lane.b32.xlu1 %v3151_v25, %s2868_s12 }
 0x2ce   :  { %v362_v26 = vpop.permute.xlu1 %361  ;;  %v310_v27 = vpop.permute.xlu0 %309 }
 0x2cf   :  { %v316_v28 = vsel %vm311_vm3, %v310_v27, 0  ;;  %v367_v29 = vsel %vm311_vm3, %v362_v26, 0 }
 0x2d0   :  { %2466 = vmatpush3.bf16.xpose.msra.mxu1 %v316_v28  ;;  %2472 = vmatpush3.bf16.xpose.msra.mxu0 %v367_v29 }
 0x2d1   :  { %2477 = vmatprep.subr.bf16.mxu1 %v2860_v63  ;;  %2483 = vmatprep.subr.bf16.mxu0 %v2860_v63 }
 0x2d2   :  { %v413_v30 = vpop.permute.xlu1 %412  ;;  %v464_v31 = vpop.permute.xlu0 %463 }
 0x2d3   :  { %v418_v33 = vsel %vm311_vm3, %v413_v30, 0  ;;  %v469_v34 = vsel %vm311_vm3, %v464_v31, 0 }
 0x2d6   :  { %v360_v32 = vpop.permute.xlu1 %359  ;;  %v462_v35 = vpop.permute.xlu0 %461 }
 0x2d7   :  { %2468 = vmatmul.mubr.msk.bf16.vlgmr.msra.gmra.mrb[4].mxu1 %vm311_vm3, %v3151_v25  ;;  %2474 = vmatmul.mubr.msk.bf16.vlgmr.msra.gmra.mrb[0].mxu0 %vm311_vm3, %v360_v32 }
 0x2d8   :  { %2478 = vmatpush3.bf16.xpose.msra.mxu1 %v418_v33  ;;  %2484 = vmatpush3.bf16.xpose.msra.mxu0 %v469_v34 }
 0x2d9   :  { %2479 = vmatprep.mubr.msk.bf16.mxu1 %vm2861_vm2, %v2860_v63  ;;  %2485 = vmatprep.mubr.msk.bf16.mxu0 %vm2861_vm2, %v2860_v63 }
 0x2da   :  { %2489 = vmatprep.subr.bf16.mxu1 %v2860_v63  ;;  %2495 = vmatprep.subr.bf16.mxu0 %v2860_v63  ;;  %v411_v36 = vpop.permute.xlu1 %410 }
 0x2df   :  { %2480 = vmatmul.mubr.msk.bf16.vlgmr.msra.gmra.mrb[8].mxu1 %vm311_vm3, %v411_v36  ;;  %2486 = vmatmul.mubr.msk.bf16.vlgmr.msra.gmra.mrb[4].mxu0 %vm311_vm3, %v462_v35 }
 0x2e0   :  { %2491 = vmatprep.mubr.msk.bf16.mxu1 %vm2861_vm2, %v2860_v63  ;;  %2497 = vmatprep.mubr.msk.bf16.mxu0 %vm2861_vm2, %v2860_v63 }
 0x3aa   :  { %v352_v51 = vpop.f32.mrb[4].mxu1  ;;  %v403_v52 = vpop.f32.mrb[0].mxu0 }
 0x3ab   :  { %v512_v55 = vmul.f32 %v352_v51, %v3193_v48  ;;  %v514_v56 = vmul.f32 %v403_v52, %v3193_v48  ;;  %v2469_v57 = vpop.f32.mrb[5].mxu1  ;;  %v2475_v58 = vpop.f32.mrb[1].mxu0 }
 0x3ac   :  { %v355_v59 = vpop.f32.mrb[6].mxu1  ;;  %v406_v60 = vpop.f32.mrb[2].mxu0 }
 0x3ad   :  { %v513_v62 = vmul.f32 %v355_v59, %v3198_v53  ;;  %v2470_v0 = vpop.f32.mrb[7].mxu1  ;;  %v2476_v1 = vpop.f32.mrb[3].mxu0  ;;  %v522_v2 = vadd.f32 %v514_v56, %v3200_v54  ;;  %v520_v3 = vadd.f32 %v512_v55, %v3200_v54  ;;  %v515_v4 = vmul.f32 %v406_v60, %v3198_v53 }
 0x3af   :  { %v535_v5 = vsel %vm528_vm10, %v522_v2, -inf  ;;  %v529_v6 = vsel %vm528_vm10, %v520_v3, -inf  ;;  %v521_v7 = vadd.f32 %v513_v62, %v3206_v61  ;;  %v523_v10 = vadd.f32 %v515_v4, %v3206_v61 }
 0x3b0   :  { %536 = vmax.xlane.f32.xlu0 %v535_v5  ;;  %530 = vmax.xlane.f32.xlu1 %v529_v6 }
 0x3b1   :  { %v532_v15 = vsel %vm528_vm10, %v521_v7, -inf  ;;  %v538_v22 = vsel %vm528_vm10, %v523_v10, -inf }
 0x3b2   :  { %v454_v8 = vpop.f32.mrb[8].mxu1  ;;  %v505_v9 = vpop.f32.mrb[4].mxu0 }
 0x3b3   :  { %v516_v11 = vmul.f32 %v454_v8, %v3193_v48  ;;  %v518_v12 = vmul.f32 %v505_v9, %v3193_v48  ;;  %v2481_v13 = vpop.f32.mrb[9].mxu1  ;;  %v2487_v14 = vpop.f32.mrb[5].mxu0 }
 0x3b4   :  { %v508_v16 = vpop.f32.mrb[6].mxu0  ;;  %533 = vmax.xlane.f32.xlu0 %v532_v15  ;;  %v457_v17 = vpop.f32.mrb[10].mxu1 }
 0x3b5   :  { %v517_v18 = vmul.f32 %v457_v17, %v3198_v53  ;;  %v2482_v19 = vpop.f32.mrb[11].mxu1  ;;  %v2488_v20 = vpop.f32.mrb[7].mxu0  ;;  %v524_v21 = vadd.f32 %v516_v11, %v3200_v54  ;;  %v519_v23 = vmul.f32 %v508_v16, %v3198_v53  ;;  %v526_v26 = vadd.f32 %v518_v12, %v3200_v54 }
 0x3b7   :  { %v541_v24 = vsel %vm528_vm10, %v524_v21, -inf  ;;  %v525_v27 = vadd.f32 %v517_v18, %v3206_v61  ;;  %v547_v28 = vsel %vm528_vm10, %v526_v26, -inf  ;;  %v527_v30 = vadd.f32 %v519_v23, %v3206_v61 }
 0x3b8   :  { %539 = vmax.xlane.f32.xlu0 %v538_v22  ;;  %542 = vmax.xlane.f32.xlu1 %v541_v24 }
 0x3b9   :  { %v544_v29 = vsel %vm528_vm10, %v525_v27, -inf  ;;  %v550_v31 = vsel %vm528_vm10, %v527_v30, -inf }
 0x3bc   :  { %548 = vmax.xlane.f32.xlu1 %v547_v28  ;;  %545 = vmax.xlane.f32.xlu0 %v544_v29 }
 0x3c0   :  { %551 = vmax.xlane.f32.xlu0 %v550_v31 }
 0x3cd   :  { %621 = vrot.lane.b32.xlu1 %v3151_v25, %s2870_s21 }
 0x43d   :  { %v537_v32 = vpop.xlane.xlu0 %536  ;;  %v531_v33 = vpop.xlane.xlu1 %530 }
 0x43e   :  { %v555_v34 = vsub.f32 %v522_v2, %v537_v32  ;;  %v553_v35 = vsub.f32 %v520_v3, %v531_v33 }
 0x440   :  { %v561_v36 = vmul.f32 1.442695, %v553_v35  ;;  %v565_v37 = vmul.f32 1.442695, %v555_v34 }
 0x441   :  { %v534_v38 = vpop.xlane.xlu0 %533 }
 0x442   :  { %v554_v39 = vsub.f32 %v521_v7, %v534_v38  ;;  %2733 = vpow2.f32 %v561_v36 }
 0x443   :  { %2735 = vpow2.f32 %v565_v37 }
 0x444   :  { %v563_v40 = vmul.f32 1.442695, %v554_v39 }
 0x445   :  { %v540_v41 = vpop.xlane.xlu0 %539  ;;  %v543_v42 = vpop.xlane.xlu1 %542 }
 0x446   :  { %2737 = vpow2.f32 %v563_v40  ;;  %v556_v43 = vsub.f32 %v523_v10, %v540_v41  ;;  %v557_v44 = vsub.f32 %v524_v21, %v543_v42 }
 0x448   :  { %v567_v45 = vmul.f32 1.442695, %v556_v43  ;;  %v569_v46 = vmul.f32 1.442695, %v557_v44 }
 0x449   :  { %v549_v49 = vpop.xlane.xlu1 %548  ;;  %v546_v51 = vpop.xlane.xlu0 %545 }
 0x44a   :  { %2739 = vpow2.f32 %v567_v45  ;;  %v559_v52 = vsub.f32 %v526_v26, %v549_v49  ;;  %v558_v55 = vsub.f32 %v525_v27, %v546_v51 }
 0x44b   :  { %2741 = vpow2.f32 %v569_v46 }
 0x44c   :  { %v573_v56 = vmul.f32 1.442695, %v559_v52  ;;  %v571_v57 = vmul.f32 1.442695, %v558_v55  ;;  %v2734_v58 = vpop.eup %2733  ;;  %v2701_v55 = vld [vmem:[%s3618_s7] sm:$0xff]  }
 0x44d   :  { %v622_v59 = vpop.permute.xlu1 %621  ;;  %v552_v60 = vpop.xlane.xlu0 %551  ;;  %v577_v0 = vsel %vm528_vm10, %v2734_v58, 0.0 }
 0x44e   :  { %2743 = vpow2.f32 %v573_v56  ;;  %v560_v62 = vsub.f32 %v527_v30, %v552_v60  ;;  %2490 = vmatpush3.bf16.msra.mxu1 %v622_v59  ;;  %v2736_v1 = vpop.eup %2735  ;;  %578 = vadd.xlane.f32.xlu1 %v577_v0  ;;  %v2702_v59 = vld [vmem:[%s3618_s7 + $0x8] sm:$0xff]  }
 0x44f   :  { %2745 = vpow2.f32 %v571_v57  ;;  %2501 = vmatprep.subr.bf16.mxu1 %v2860_v63  ;;  %v583_v5 = vsel %vm528_vm10, %v2736_v1, 0.0 }
 0x450   :  { %v2738_v2 = vpop.eup %2737  ;;  %v575_v3 = vmul.f32 1.442695, %v560_v62 }
 0x451   :  { %v580_v4 = vsel %vm528_vm10, %v2738_v2, 0.0 }
 0x452   :  { %2747 = vpow2.f32 %v575_v3  ;;  %581 = vadd.xlane.f32.xlu0 %v580_v4  ;;  %584 = vadd.xlane.f32.xlu1 %v583_v5 }
 0x454   :  { %v2740_v6 = vpop.eup %2739 }
 0x455   :  { %v2742_v7 = vpop.eup %2741  ;;  %v586_v8 = vsel %vm528_vm10, %v2740_v6, 0.0 }
 0x456   :  { %v589_v9 = vsel %vm528_vm10, %v2742_v7, 0.0  ;;  %587 = vadd.xlane.f32.xlu0 %v586_v8 }
 0x457   :  { %590 = vadd.xlane.f32.xlu1 %v589_v9 }
 0x458   :  { %v2744_v10 = vpop.eup %2743 }
 0x459   :  { %v2746_v11 = vpop.eup %2745  ;;  %v595_v12 = vsel %vm528_vm10, %v2744_v10, 0.0 }
 0x45a   :  { %v592_v13 = vsel %vm528_vm10, %v2746_v11, 0.0 }
 0x45b   :  { %596 = vadd.xlane.f32.xlu1 %v595_v12  ;;  %593 = vadd.xlane.f32.xlu0 %v592_v13 }
 0x45c   :  { %v2748_v14 = vpop.eup %2747 }
 0x45d   :  { %v598_v15 = vsel %vm528_vm10, %v2748_v14, 0.0 }
 0x45f   :  { %599 = vadd.xlane.f32.xlu0 %v598_v15 }
 0x46c   :  { %715 = vrot.lane.b32.xlu1 %v3151_v25, %s2871_s0 }
 0x470   :  { %762 = vrot.lane.b32.xlu1 %v3151_v25, %s2872_s2 }
 0x475   :  { %668 = vrot.lane.b32.xlu0 %v3151_v25, %s2873_s24 }
 0x4db   :  { %v579_v16 = vpop.xlane.xlu1 %578 }
 0x4dc   :  { %2749 = vrcp.f32 %v579_v16 }
 0x4df   :  { %v582_v17 = vpop.xlane.xlu0 %581  ;;  %v585_v18 = vpop.xlane.xlu1 %584 }
 0x4e0   :  { %2751 = vrcp.f32 %v582_v17 }
 0x4e1   :  { %2753 = vrcp.f32 %v585_v18 }
 0x4e3   :  { %v588_v19 = vpop.xlane.xlu0 %587 }
 0x4e4   :  { %v591_v20 = vpop.xlane.xlu1 %590  ;;  %2755 = vrcp.f32 %v588_v19 }
 0x4e5   :  { %2757 = vrcp.f32 %v591_v20 }
 0x4e6   :  { %v2750_v21 = vpop.eup %2749 }
 0x4e7   :  { %v609_v26 = vmul.f32 %v2750_v21, %v2734_v58 }
 0x4e8   :  { %v597_v22 = vpop.xlane.xlu1 %596  ;;  %v594_v23 = vpop.xlane.xlu0 %593 }
 0x4e9   :  { %2759 = vrcp.f32 %v594_v23 }
 0x4ea   :  { %v2752_v24 = vpop.eup %2751  ;;  %2761 = vrcp.f32 %v597_v22 }
 0x4eb   :  { %v610_v27 = vmul.f32 %v2752_v24, %v2738_v2  ;;  %v2754_v28 = vpop.eup %2753 }
 0x4ec   :  { %v600_v25 = vpop.xlane.xlu0 %599  ;;  %v716_v31 = vpop.permute.xlu1 %715  ;;  %v611_v32 = vmul.f32 %v2754_v28, %v2736_v1  ;;  %v2293_v28 = vld [vmem:[%s3619_s8] ss:$0 sm:$0xff] }
 0x4ed   :  { %2763 = vrcp.f32 %v600_v25  ;;  %v617_v29 = vpack.c.bf16 %v610_v27, %v609_v26 }
 0x4ee   :  { %v2756_v30 = vpop.eup %2755 }
 0x4ef   :  { %v612_v33 = vmul.f32 %v2756_v30, %v2740_v6  ;;  %2492 = vmatmul.mubr.msk.bf16.vlgmr.msra.gmra.mrb[12].mxu1 %vm528_vm10, %v617_v29  ;;  %v2758_v36 = vpop.eup %2757 }
 0x4f0   :  { %2502 = vmatpush3.bf16.msra.mxu1 %v716_v31  ;;  %v669_v34 = vpop.permute.xlu0 %668  ;;  %2503 = vmatprep.mubr.msk.bf16.mxu1 %vm2861_vm2, %v2860_v63  ;;  %v763_v38 = vpop.permute.xlu1 %762  ;;  %v613_v40 = vmul.f32 %v2758_v36, %v2742_v7 }
 0x4f1   :  { %2496 = vmatpush3.bf16.msra.mxu0 %v669_v34  ;;  %v618_v35 = vpack.c.bf16 %v612_v33, %v611_v32  ;;  %2513 = vmatprep.subr.bf16.mxu1 %v2860_v63 }
 0x4f2   :  { %2507 = vmatprep.subr.bf16.mxu0 %v2860_v63 }
 0x4f3   :  { %v2760_v37 = vpop.eup %2759 }
 0x4f4   :  { %2498 = vmatmul.mubr.msk.bf16.vlgmr.msra.gmra.mrb[8].mxu0 %vm528_vm10, %v618_v35  ;;  %v2762_v39 = vpop.eup %2761  ;;  %v614_v41 = vmul.f32 %v2760_v37, %v2746_v11 }
 0x4f5   :  { %2508 = vmatpush3.bf16.msra.mxu0 %v763_v38  ;;  %2509 = vmatprep.mubr.msk.bf16.mxu0 %vm2861_vm2, %v2860_v63  ;;  %v615_v44 = vmul.f32 %v2762_v39, %v2744_v10 }
 0x4f6   :  { %2521 = vmatprep.subr.bf16.mxu0 %v2860_v63  ;;  %v619_v43 = vpack.c.bf16 %v614_v41, %v613_v40 }
 0x4f7   :  { %v2764_v42 = vpop.eup %2763 }
 0x4f8   :  { %v616_v45 = vmul.f32 %v2764_v42, %v2748_v14  ;;  %2504 = vmatmul.mubr.msk.bf16.vlgmr.msra.gmra.mrb[16].mxu1 %vm528_vm10, %v619_v43 }
 0x4f9   :  { %2517 = vmatprep.mubr.msk.bf16.mxu1 %vm2861_vm2, %v2860_v63  ;;  %2514 = vmatpush3.bf16.msra.mxu1 %v2701_v55 }
 0x4fa   :  { %v620_v46 = vpack.c.bf16 %v616_v45, %v615_v44  ;;  %2515 = vmatprep.subr.bf16.mxu1 %v2860_v63 }
 0x4fc   :  { %2510 = vmatmul.mubr.msk.bf16.vlgmr.msra.gmra.mrb[12].mxu0 %vm528_vm10, %v620_v46  ;;  %v2703_v46 = vld [vmem:[%s3622_s11] sm:$0xff]  }
 0x4fd   :  { %2525 = vmatprep.mubr.msk.bf16.mxu0 %vm2861_vm2, %v2860_v63  ;;  %2516 = vmatpush3.bf16.msra.mxu1 %v2702_v59 }
 0x4fe   :  { %2529 = vmatprep.subr.bf16.mxu1 %v2860_v63  ;;  %2522 = vmatpush3.bf16.msra.mxu0 %v2703_v46 }
 0x4ff   :  { %2523 = vmatprep.subr.bf16.mxu0 %v2860_v63 }
 0x5c2   :  { %v661_v49 = vpop.f32.mrb[12].mxu1 }
 0x5c3   :  { %v2493_v51 = vpop.f32.mrb[13].mxu1 }
 0x5c4   :  { %v664_v52 = vpop.f32.mrb[14].mxu1 }
 0x5c5   :  { %v2494_v56 = vpop.f32.mrb[15].mxu1 }
 0x5c7   :  { %v708_v57 = vpop.f32.mrb[8].mxu0 }
 0x5c8   :  { %v2499_v58 = vpop.f32.mrb[9].mxu0 }
 0x5c9   :  { %v711_v60 = vpop.f32.mrb[10].mxu0 }
 0x5ca   :  { %v2669_v62 = vpack.i.bf16 %v711_v60, %v708_v57  ;;  %v2500_v0 = vpop.f32.mrb[11].mxu0 }
 0x5cb   :  { %v755_v1 = vpop.f32.mrb[16].mxu1 }
 0x5cc   :  { %2670 = vrot.lane.b32.xlu1 %v2669_v62, %s2874_s25  ;;  %v2505_v2 = vpop.f32.mrb[17].mxu1  ;;  %v2297_v62 = vld [vmem:[%s3620_s9] ss:$0 sm:$0xff] }
 0x5cd   :  { %v758_v3 = vpop.f32.mrb[18].mxu1 }
 0x5ce   :  { %v2674_v4 = vpack.i.bf16 %v758_v3, %v755_v1  ;;  %v2506_v5 = vpop.f32.mrb[19].mxu1  ;;  %v2298_v3 = vld [vmem:[%s3655_s1] ss:$0 sm:$0xff] }
 0x5cf   :  { %v802_v6 = vpop.f32.mrb[12].mxu0 }
 0x5d0   :  { %v2511_v7 = vpop.f32.mrb[13].mxu0  ;;  %2675 = vrot.lane.b32.xlu0 %v2674_v4, %s2875_s15 }
 0x5d1   :  { %v805_v8 = vpop.f32.mrb[14].mxu0 }
 0x5d2   :  { %v2679_v9 = vpack.i.bf16 %v805_v8, %v802_v6  ;;  %v2512_v10 = vpop.f32.mrb[15].mxu0  ;;  %v2705_v8 = vld [vmem:[%s3656_s14] sm:$0xff]  }
 0x5d3   :  { %v2707_v10 = vld [vmem:[%s3656_s14 + $0x10] sm:$0xff]  }
 0x5d4   :  { %2680 = vrot.lane.b32.xlu1 %v2679_v9, %s3638_s10  ;;  %v2706_v9 = vld [vmem:[%s3656_s14 + $0x8] sm:$0xff]  }
 0x63e   :  { %v2671_v11 = vpop.permute.xlu1 %2670 }
 0x63f   :  { %v2673_v12 = vunpack.i.h.bf16 %v2671_v11  ;;  %v2672_v13 = vunpack.i.l.bf16 %v2671_v11  ;;  %v2708_v11 = vld [vmem:[%s3656_s14 + $0x18] sm:$0xff]  }
 0x641   :  { %v833_v18 = vsel %vm311_vm3, %v661_v49, %v2672_v13  ;;  %v834_v19 = vsel %vm311_vm3, %v664_v52, %v2673_v12  ;;  %v2704_v49 = vld [vmem:[%s3622_s11 + $0x8] sm:$0xff]   ;;  %v2709_v12 = vld [vmem:[%s3656_s14 + $0x20] sm:$0xff]  }
 0x642   :  { %v2676_v14 = vpop.permute.xlu0 %2675  ;;  %2524 = vmatpush3.bf16.msra.mxu0 %v2704_v49  ;;  %v2710_v13 = vld [vmem:[%s3656_s14 + $0x28] sm:$0xff]  }
 0x643   :  { %v2678_v15 = vunpack.i.h.bf16 %v2676_v14  ;;  %v2677_v16 = vunpack.i.l.bf16 %v2676_v14  ;;  %2549 = vmatprep.subr.bf16.mxu0 %v2860_v63  ;;  %v2711_v14 = vld [vmem:[%s3656_s14 + $0x30] sm:$0xff]  }
 0x645   :  { %v836_v22 = vsel %vm528_vm10, %v834_v19, %v2678_v15  ;;  %v835_v23 = vsel %vm528_vm10, %v833_v18, %v2677_v16  ;;  %v2712_v15 = vld [vmem:[%s3656_s14 + $0x38] sm:$0xff]   ;;  %v2299_v16 = vld [vmem:[%s3657_s23] ss:$0 sm:$0xff] }
 0x646   :  { %v2681_v17 = vpop.permute.xlu1 %2680 }
 0x647   :  { %v2683_v20 = vunpack.i.h.bf16 %v2681_v17  ;;  %v2682_v21 = vunpack.i.l.bf16 %v2681_v17 }
 0x649   :  { %v838_v24 = vsel %vm837_vm11, %v835_v23, %v2682_v21  ;;  %v839_v26 = vsel %vm837_vm11, %v836_v22, %v2683_v20 }
 0x64a   :  { %v840_v27 = vpack.c.bf16 %v839_v26, %v838_v24 }
 0x64c   :  { %2518 = vmatmul.mubr.msk.bf16.vlgmr.msra.gmra.mrb[20].mxu1 %vm195_vm1, %v840_v27 }
 0x64d   :  { %2545 = vmatprep.mubr.msk.bf16.mxu1 %vm2861_vm2, %v2860_v63  ;;  %2530 = vmatpush3.bf16.msra.mxu1 %v2705_v8 }
 0x64e   :  { %2531 = vmatprep.subr.bf16.mxu1 %v2860_v63 }
 0x651   :  { %2532 = vmatpush3.bf16.msra.mxu1 %v2706_v9 }
 0x652   :  { %2533 = vmatprep.subr.bf16.mxu1 %v2860_v63 }
 0x655   :  { %2534 = vmatpush3.bf16.msra.mxu1 %v2707_v10 }
 0x656   :  { %2535 = vmatprep.subr.bf16.mxu1 %v2860_v63 }
 0x659   :  { %2536 = vmatpush3.bf16.msra.mxu1 %v2708_v11 }
 0x65a   :  { %2537 = vmatprep.subr.bf16.mxu1 %v2860_v63 }
 0x65d   :  { %2538 = vmatpush3.bf16.msra.mxu1 %v2709_v12 }
 0x65e   :  { %2539 = vmatprep.subr.bf16.mxu1 %v2860_v63 }
 0x661   :  { %2540 = vmatpush3.bf16.msra.mxu1 %v2710_v13  ;;  %v2314_v13 = vld [vmem:[%s3614_s3 + $0x1] ss:$0 sm:$0xff] }
 0x662   :  { %2541 = vmatprep.subr.bf16.mxu1 %v2860_v63 }
 0x665   :  { %2542 = vmatpush3.bf16.msra.mxu1 %v2711_v14 }
 0x666   :  { %2543 = vmatprep.subr.bf16.mxu1 %v2860_v63 }
 0x669   :  { %2544 = vmatpush3.bf16.msra.mxu1 %v2712_v15 }
 0x66a   :  { %2575 = vmatprep.subr.bf16.mxu1 %v2860_v63 }
 0x71f   :  { %v901_v25 = vpop.f32.mrb[20].mxu1 }
 0x720   :  { %v902_v29 = vadd.f32 %v2293_v28, %v901_v25  ;;  %v2519_v30 = vpop.f32.mrb[21].mxu1 }
 0x721   :  { %v904_v31 = vpop.f32.mrb[22].mxu1 }
 0x722   :  { %v3286_v32 = vadd.f32 %v902_v29, %v3109_v47  ;;  %v905_v33 = vadd.f32 %v2293_v28, %v904_v31  ;;  %v2520_v34 = vpop.f32.mrb[23].mxu1 }
 0x724   :  { %v3289_v35 = vadd.f32 %v905_v33, %v3117_v50  ;;  %v912_v36 = vsel %vm195_vm1, %v3286_v32, 0.0 }
 0x725   :  { %913 = vadd.xlane.f32.xlu0 %v912_v36 }
 0x726   :  { %v915_v37 = vsel %vm195_vm1, %v3289_v35, 0.0 }
 0x727   :  { %916 = vadd.xlane.f32.xlu1 %v915_v37 }
 0x7b2   :  { %v914_v38 = vpop.xlane.xlu0 %913 }
 0x7b3   :  { %v918_v39 = vmul.f32 0.03125, %v914_v38 }
 0x7b4   :  { %v917_v40 = vpop.xlane.xlu1 %916 }
 0x7b5   :  { %v920_v41 = vsub.f32 %v3286_v32, %v918_v39  ;;  %v919_v47 = vmul.f32 0.03125, %v917_v40 }
 0x7b7   :  { %v921_v42 = vsub.f32 %v3289_v35, %v919_v47  ;;  %v922_v43 = vmul.f32 %v920_v41, %v920_v41 }
 0x7b9   :  { %v924_v50 = vsel %vm195_vm1, %v922_v43, 0.0  ;;  %v923_v44 = vmul.f32 %v921_v42, %v921_v42  ;;  %v2303_v43 = vld [vmem:[%s3658_s18] ss:$0 sm:$0xff] }
 0x7ba   :  { %925 = vadd.xlane.f32.xlu0 %v924_v50 }
 0x7bb   :  { %v927_v45 = vsel %vm195_vm1, %v923_v44, 0.0 }
 0x7be   :  { %928 = vadd.xlane.f32.xlu0 %v927_v45 }
 0x847   :  { %v926_v51 = vpop.xlane.xlu0 %925 }
 0x848   :  { %v930_v52 = vmul.f32 0.03125, %v926_v51 }
 0x84a   :  { %v932_v55 = vadd.f32 1e-05, %v930_v52 }
 0x84b   :  { %v929_v56 = vpop.xlane.xlu0 %928 }
 0x84c   :  { %2765 = vrsqrt.f32 %v932_v55  ;;  %v931_v57 = vmul.f32 0.03125, %v929_v56 }
 0x84e   :  { %v933_v58 = vadd.f32 1e-05, %v931_v57 }
 0x850   :  { %2767 = vrsqrt.f32 %v933_v58 }
 0x856   :  { %v2766_v59 = vpop.eup %2765 }
 0x857   :  { %v936_v60 = vmul.f32 %v2766_v59, %v920_v41 }
 0x859   :  { %v944_v1 = vmul.f32 %v2297_v62, %v936_v60 }
 0x85a   :  { %v2768_v0 = vpop.eup %2767 }
 0x85b   :  { %v937_v2 = vmul.f32 %v2768_v0, %v921_v42  ;;  %v952_v5 = vadd.f32 %v2298_v3, %v944_v1 }
 0x85d   :  { %v945_v4 = vmul.f32 %v2297_v62, %v937_v2 }
 0x85f   :  { %v953_v6 = vadd.f32 %v2298_v3, %v945_v4  ;;  %v2713_v4 = vld [vmem:[%s3616_s5 + $0x10] sm:$0xff]  }
 0x861   :  { %v954_v7 = vpack.c.bf16 %v953_v6, %v952_v5  ;;  %v2714_v5 = vld [vmem:[%s3616_s5 + $0x18] sm:$0xff]  }
 0x863   :  { %2526 = vmatmul.mubr.msk.bf16.vlgmr.msra.gmra.mrb[16].mxu0 %vm195_vm1, %v954_v7 }
 0x864   :  { %2553 = vmatprep.mubr.msk.bf16.mxu0 %vm2861_vm2, %v2860_v63  ;;  %2550 = vmatpush3.bf16.msra.mxu0 %v2713_v4 }
 0x865   :  { %2551 = vmatprep.subr.bf16.mxu0 %v2860_v63 }
 0x868   :  { %2552 = vmatpush3.bf16.msra.mxu0 %v2714_v5 }
 0x869   :  { %2557 = vmatprep.subr.bf16.mxu0 %v2860_v63 }
 0x936   :  { %v1015_v17 = vpop.f32.mrb[16].mxu0 }
 0x937   :  { %v1016_v18 = vadd.f32 %v2299_v16, %v1015_v17  ;;  %v2527_v19 = vpop.f32.mrb[17].mxu0 }
 0x938   :  { %v1018_v20 = vpop.f32.mrb[18].mxu0 }
 0x939   :  { %v1024_v21 = vmul.f32 0.044715, %v1016_v18  ;;  %v1019_v22 = vadd.f32 %v2299_v16, %v1018_v20  ;;  %v2528_v23 = vpop.f32.mrb[19].mxu0  ;;  %v1022_v38 = vmul.f32 0.5, %v1016_v18 }
 0x93a   :  { %v2321_v23 = vld [vmem:[%s3617_s6 + $0x1] ss:$0 sm:$0xff] }
 0x93b   :  { %v1026_v24 = vmul.f32 %v1024_v21, %v1016_v18  ;;  %v1025_v26 = vmul.f32 0.044715, %v1019_v22  ;;  %v1023_v39 = vmul.f32 0.5, %v1019_v22 }
 0x93d   :  { %v1028_v27 = vmul.f32 %v1026_v24, %v1016_v18  ;;  %v1027_v28 = vmul.f32 %v1025_v26, %v1019_v22 }
 0x93f   :  { %v1030_v25 = vadd.f32 %v1028_v27, %v1016_v18  ;;  %v1029_v29 = vmul.f32 %v1027_v28, %v1019_v22  ;;  %v2315_v18 = vld [vmem:[%s3615_s4 + $0x1] ss:$0 sm:$0xff] }
 0x941   :  { %v1032_v30 = vmul.f32 0.7978846, %v1030_v25  ;;  %v1031_v31 = vadd.f32 %v1029_v29, %v1019_v22 }
 0x943   :  { %2769 = vtanh.f32 %v1032_v30  ;;  %v1033_v33 = vmul.f32 0.7978846, %v1031_v31 }
 0x945   :  { %2771 = vtanh.f32 %v1033_v33 }
 0x94d   :  { %v2770_v34 = vpop.eup %2769 }
 0x94e   :  { %v1036_v36 = vadd.f32 1.0, %v2770_v34 }
 0x94f   :  { %v2772_v37 = vpop.eup %2771 }
 0x950   :  { %v1037_v40 = vadd.f32 1.0, %v2772_v37  ;;  %v1038_v41 = vmul.f32 %v1036_v36, %v1022_v38 }
 0x952   :  { %v1039_v47 = vmul.f32 %v1037_v40, %v1023_v39 }
 0x954   :  { %v1040_v42 = vpack.c.bf16 %v1039_v47, %v1038_v41 }
 0x956   :  { %2546 = vmatmul.mubr.bf16.vlgmr.msra.gmra.mrb[24].mxu1 %v1040_v42 }
 0x957   :  { %2577 = vmatprep.mubr.msk.bf16.mxu1 %vm2861_vm2, %v2860_v63 }
 0xa29   :  { %v1146_v50 = vpop.f32.mrb[24].mxu1 }
 0xa2a   :  { %v1147_v44 = vadd.f32 %v2303_v43, %v1146_v50  ;;  %v2547_v45 = vpop.f32.mrb[25].mxu1 }
 0xa2b   :  { %v1149_v46 = vpop.f32.mrb[26].mxu1 }
 0xa2c   :  { %v3357_v49 = vadd.f32 %v1147_v44, %v3286_v32  ;;  %v1150_v51 = vadd.f32 %v2303_v43, %v1149_v46  ;;  %v2548_v52 = vpop.f32.mrb[27].mxu1 }
 0xa2e   :  { %v3360_v55 = vadd.f32 %v1150_v51, %v3289_v35  ;;  %v1159_v56 = vsel %vm195_vm1, %v3357_v49, 0.0 }
 0xa2f   :  { %1160 = vadd.xlane.f32.xlu0 %v1159_v56 }
 0xa30   :  { %v1162_v57 = vsel %vm195_vm1, %v3360_v55, 0.0 }
 0xa31   :  { %1163 = vadd.xlane.f32.xlu1 %v1162_v57 }
 0xabc   :  { %v1161_v58 = vpop.xlane.xlu0 %1160 }
 0xabd   :  { %v1165_v59 = vmul.f32 0.03125, %v1161_v58 }
 0xabe   :  { %v1164_v60 = vpop.xlane.xlu1 %1163 }
 0xabf   :  { %v1167_v62 = vsub.f32 %v3357_v49, %v1165_v59  ;;  %v1166_v32 = vmul.f32 0.03125, %v1164_v60 }
 0xac1   :  { %v1168_v0 = vsub.f32 %v3360_v55, %v1166_v32  ;;  %v1169_v1 = vmul.f32 %v1167_v62, %v1167_v62 }
 0xac3   :  { %v1171_v35 = vsel %vm195_vm1, %v1169_v1, 0.0  ;;  %v1170_v2 = vmul.f32 %v1168_v0, %v1168_v0 }
 0xac4   :  { %1172 = vadd.xlane.f32.xlu0 %v1171_v35 }
 0xac5   :  { %v1174_v3 = vsel %vm195_vm1, %v1170_v2, 0.0 }
 0xac6   :  { %1175 = vadd.xlane.f32.xlu1 %v1174_v3 }
 0xb51   :  { %v1173_v6 = vpop.xlane.xlu0 %1172 }
 0xb52   :  { %v1177_v7 = vmul.f32 0.03125, %v1173_v6 }
 0xb53   :  { %v1176_v8 = vpop.xlane.xlu1 %1175 }
 0xb54   :  { %v1179_v9 = vadd.f32 1e-05, %v1177_v7  ;;  %v1178_v10 = vmul.f32 0.03125, %v1176_v8 }
 0xb56   :  { %2773 = vrsqrt.f32 %v1179_v9  ;;  %v1180_v11 = vadd.f32 1e-05, %v1178_v10 }
 0xb58   :  { %2775 = vrsqrt.f32 %v1180_v11 }
 0xb60   :  { %v2774_v12 = vpop.eup %2773 }
 0xb61   :  { %v1183_v14 = vmul.f32 %v2774_v12, %v1167_v62 }
 0xb62   :  { %v2776_v15 = vpop.eup %2775 }
 0xb63   :  { %v1191_v16 = vmul.f32 %v2314_v13, %v1183_v14  ;;  %v1184_v17 = vmul.f32 %v2776_v15, %v1168_v0 }
 0xb65   :  { %v1192_v19 = vmul.f32 %v2314_v13, %v1184_v17  ;;  %v1199_v20 = vadd.f32 %v2315_v18, %v1191_v16 }
 0xb67   :  { %v1200_v21 = vadd.f32 %v2315_v18, %v1192_v19 }
 0xb69   :  { %v1201_v22 = vpack.c.bf16 %v1200_v21, %v1199_v20 }
 0xb6b   :  { %2554 = vmatmul.mubr.msk.bf16.vlgmr.msra.gmra.mrb[20].mxu0 %vm195_vm1, %v1201_v22 }
 0xb6c   :  { %2559 = vmatprep.mubr.msk.bf16.mxu0 %vm2861_vm2, %v2860_v63 }
 0xc3e   :  { %v1264_v24 = vpop.f32.mrb[20].mxu0 }
 0xc3f   :  { %v2555_v26 = vpop.f32.mrb[21].mxu0  ;;  %v1265_v28 = vadd.f32 %v2321_v23, %v1264_v24 }
 0xc40   :  { %v1267_v27 = vpop.f32.mrb[22].mxu0 }
 0xc41   :  { %v1268_v25 = vadd.f32 %v2321_v23, %v1267_v27  ;;  %v2556_v29 = vpop.f32.mrb[23].mxu0 }
 0xc43   :  { %v3390_v30 = vpack.c.bf16 %v1268_v25, %v1265_v28 }
 0xc45   :  { %1324 = vrot.lane.b32.xlu1 %v3390_v30, %s2862_s22  ;;  %1273 = vrot.lane.b32.xlu0 %v3390_v30, %s2863_s17 }
 0xc49   :  { %1322 = vrot.lane.b32.xlu1 %v3390_v30, %s2866_s26  ;;  %1426 = vrot.lane.b32.xlu0 %v3390_v30, %s2865_s28 }
 0xc4d   :  { %1375 = vrot.lane.b32.xlu1 %v3390_v30, %s2864_s27  ;;  %1424 = vrot.lane.b32.xlu0 %v3390_v30, %s2867_s30 }
 0xc51   :  { %1373 = vrot.lane.b32.xlu1 %v3390_v30, %s2868_s12 }
 0xcb7   :  { %v1274_v31 = vpop.permute.xlu0 %1273  ;;  %v1325_v34 = vpop.permute.xlu1 %1324 }
 0xcb8   :  { %v1279_v33 = vsel %vm311_vm3, %v1274_v31, 0  ;;  %v1330_v39 = vsel %vm311_vm3, %v1325_v34, 0 }
 0xcb9   :  { %2558 = vmatpush3.bf16.xpose.msra.mxu0 %v1279_v33 }
 0xcba   :  { %2563 = vmatprep.subr.bf16.mxu0 %v2860_v63 }
 0xcbb   :  { %v1427_v36 = vpop.permute.xlu0 %1426  ;;  %v1323_v38 = vpop.permute.xlu1 %1322 }
 0xcbc   :  { %v1432_v37 = vsel %vm311_vm3, %v1427_v36, 0 }
 0xcbd   :  { %2576 = vmatpush3.bf16.xpose.msra.mxu1 %v1432_v37 }
 0xcbe   :  { %2587 = vmatprep.subr.bf16.mxu1 %v2860_v63 }
 0xcbf   :  { %v1425_v40 = vpop.permute.xlu0 %1424  ;;  %v1376_v41 = vpop.permute.xlu1 %1375 }
 0xcc0   :  { %2560 = vmatmul.mubr.msk.bf16.vlgmr.msra.gmra.mrb[24].mxu0 %vm311_vm3, %v3390_v30  ;;  %v1381_v47 = vsel %vm311_vm3, %v1376_v41, 0 }
 0xcc1   :  { %2564 = vmatpush3.bf16.xpose.msra.mxu0 %v1330_v39  ;;  %2565 = vmatprep.mubr.msk.bf16.mxu0 %vm2861_vm2, %v2860_v63 }
 0xcc2   :  { %2569 = vmatprep.subr.bf16.mxu0 %v2860_v63 }
 0xcc3   :  { %v1374_v42 = vpop.permute.xlu1 %1373 }
 0xcc4   :  { %2578 = vmatmul.mubr.msk.bf16.vlgmr.msra.gmra.mrb[28].mxu1 %vm311_vm3, %v1425_v40 }
 0xcc5   :  { %2589 = vmatprep.mubr.msk.bf16.mxu1 %vm2861_vm2, %v2860_v63 }
 0xcc8   :  { %2566 = vmatmul.mubr.msk.bf16.vlgmr.msra.gmra.mrb[28].mxu0 %vm311_vm3, %v1323_v38 }
 0xcc9   :  { %2570 = vmatpush3.bf16.xpose.msra.mxu0 %v1381_v47  ;;  %2571 = vmatprep.mubr.msk.bf16.mxu0 %vm2861_vm2, %v2860_v63 }
 0xcca   :  { %2581 = vmatprep.subr.bf16.mxu0 %v2860_v63 }
 0xcd0   :  { %2572 = vmatmul.mubr.msk.bf16.vlgmr.msra.gmra.mrb[32].mxu0 %vm311_vm3, %v1374_v42 }
 0xcd1   :  { %2583 = vmatprep.mubr.msk.bf16.mxu0 %vm2861_vm2, %v2860_v63 }
 0xd93   :  { %v1315_v43 = vpop.f32.mrb[24].mxu0 }
 0xd94   :  { %v1475_v50 = vmul.f32 %v1315_v43, %v3193_v48  ;;  %v2561_v44 = vpop.f32.mrb[25].mxu0 }
 0xd95   :  { %v1318_v45 = vpop.f32.mrb[26].mxu0 }
 0xd96   :  { %v1476_v46 = vmul.f32 %v1318_v45, %v3198_v53  ;;  %v2562_v51 = vpop.f32.mrb[27].mxu0  ;;  %v1483_v52 = vadd.f32 %v1475_v50, %v3200_v54 }
 0xd97   :  { %v1468_v56 = vpop.f32.mrb[28].mxu1 }
 0xd98   :  { %v2579_v57 = vpop.f32.mrb[29].mxu1  ;;  %v1491_v58 = vsel %vm528_vm10, %v1483_v52, -inf  ;;  %v1484_v59 = vadd.f32 %v1476_v46, %v3206_v61  ;;  %v1481_v9 = vmul.f32 %v1468_v56, %v3193_v48 }
 0xd99   :  { %1492 = vmax.xlane.f32.xlu1 %v1491_v58  ;;  %v1471_v60 = vpop.f32.mrb[30].mxu1 }
 0xd9a   :  { %v2580_v62 = vpop.f32.mrb[31].mxu1  ;;  %v1494_v32 = vsel %vm528_vm10, %v1484_v59, -inf  ;;  %v1482_v14 = vmul.f32 %v1471_v60, %v3198_v53  ;;  %v1489_v20 = vadd.f32 %v1481_v9, %v3200_v54 }
 0xd9b   :  { %1495 = vmax.xlane.f32.xlu0 %v1494_v32  ;;  %v1366_v0 = vpop.f32.mrb[28].mxu0 }
 0xd9c   :  { %v1477_v1 = vmul.f32 %v1366_v0, %v3193_v48  ;;  %v2567_v35 = vpop.f32.mrb[29].mxu0  ;;  %v1490_v21 = vadd.f32 %v1482_v14, %v3206_v61  ;;  %v1509_v22 = vsel %vm528_vm10, %v1489_v20, -inf }
 0xd9d   :  { %v1369_v2 = vpop.f32.mrb[30].mxu0 }
 0xd9e   :  { %v1478_v3 = vmul.f32 %v1369_v2, %v3198_v53  ;;  %v2568_v4 = vpop.f32.mrb[31].mxu0  ;;  %v1485_v5 = vadd.f32 %v1477_v1, %v3200_v54 }
 0xda0   :  { %v1497_v6 = vsel %vm528_vm10, %v1485_v5, -inf  ;;  %v1486_v7 = vadd.f32 %v1478_v3, %v3206_v61 }
 0xda1   :  { %1498 = vmax.xlane.f32.xlu0 %v1497_v6 }
 0xda2   :  { %v1500_v12 = vsel %vm528_vm10, %v1486_v7, -inf }
 0xda3   :  { %v1417_v8 = vpop.f32.mrb[32].mxu0 }
 0xda4   :  { %v1479_v10 = vmul.f32 %v1417_v8, %v3193_v48  ;;  %v2573_v11 = vpop.f32.mrb[33].mxu0 }
 0xda5   :  { %1501 = vmax.xlane.f32.xlu0 %v1500_v12  ;;  %v1420_v13 = vpop.f32.mrb[34].mxu0 }
 0xda6   :  { %v1480_v15 = vmul.f32 %v1420_v13, %v3198_v53  ;;  %v2574_v16 = vpop.f32.mrb[35].mxu0  ;;  %v1487_v17 = vadd.f32 %v1479_v10, %v3200_v54  ;;  %v1512_v53 = vsel %vm528_vm10, %v1490_v21, -inf }
 0xda8   :  { %v1503_v18 = vsel %vm528_vm10, %v1487_v17, -inf  ;;  %v1488_v19 = vadd.f32 %v1480_v15, %v3206_v61 }
 0xda9   :  { %1504 = vmax.xlane.f32.xlu1 %v1503_v18 }
 0xdaa   :  { %v1506_v48 = vsel %vm528_vm10, %v1488_v19, -inf }
 0xdab   :  { %1507 = vmax.xlane.f32.xlu0 %v1506_v48 }
 0xdad   :  { %1510 = vmax.xlane.f32.xlu1 %v1509_v22 }
 0xdaf   :  { %1513 = vmax.xlane.f32.xlu0 %v1512_v53 }
 0xdbe   :  { %1583 = vrot.lane.b32.xlu1 %v3390_v30, %s2870_s21  ;;  %s3661_s21 = sld [smem:[#allocation16_spill]] }
 0xe26   :  { %v1493_v23 = vpop.xlane.xlu1 %1492 }
 0xe27   :  { %v1515_v24 = vsub.f32 %v1483_v52, %v1493_v23 }
 0xe28   :  { %v1496_v26 = vpop.xlane.xlu0 %1495 }
 0xe29   :  { %v1523_v27 = vmul.f32 1.442695, %v1515_v24  ;;  %v1516_v54 = vsub.f32 %v1484_v59, %v1496_v26 }
 0xe2b   :  { %2777 = vpow2.f32 %v1523_v27  ;;  %v1525_v28 = vmul.f32 1.442695, %v1516_v54 }
 0xe2d   :  { %2779 = vpow2.f32 %v1525_v28 }
 0xe2e   :  { %v1499_v25 = vpop.xlane.xlu0 %1498 }
 0xe2f   :  { %v1517_v36 = vsub.f32 %v1485_v5, %v1499_v25 }
 0xe31   :  { %v1527_v47 = vmul.f32 1.442695, %v1517_v36 }
 0xe32   :  { %v1502_v61 = vpop.xlane.xlu0 %1501 }
 0xe33   :  { %v1518_v40 = vsub.f32 %v1486_v7, %v1502_v61 }
 0xe35   :  { %v2778_v29 = vpop.eup %2777  ;;  %v1529_v46 = vmul.f32 1.442695, %v1518_v40 }
 0xe36   :  { %v1505_v31 = vpop.xlane.xlu1 %1504  ;;  %v1539_v33 = vsel %vm528_vm10, %v2778_v29, 0.0 }
 0xe37   :  { %v2780_v34 = vpop.eup %2779  ;;  %1540 = vadd.xlane.f32.xlu1 %v1539_v33  ;;  %v1519_v43 = vsub.f32 %v1487_v17, %v1505_v31 }
 0xe38   :  { %v1508_v37 = vpop.xlane.xlu0 %1507  ;;  %v1542_v38 = vsel %vm528_vm10, %v2780_v34, 0.0 }
 0xe39   :  { %1543 = vadd.xlane.f32.xlu0 %v1542_v38  ;;  %v1520_v51 = vsub.f32 %v1488_v19, %v1508_v37  ;;  %v1531_v56 = vmul.f32 1.442695, %v1519_v43 }
 0xe3a   :  { %v1511_v39 = vpop.xlane.xlu1 %1510 }
 0xe3b   :  { %v1521_v41 = vsub.f32 %v1489_v20, %v1511_v39  ;;  %v1533_v57 = vmul.f32 1.442695, %v1520_v51  ;;  %v2715_v39 = vld [vmem:[%s3618_s7 + $0x10] sm:$0xff]  }
 0xe3c   :  { %v1514_v42 = vpop.xlane.xlu0 %1513 }
 0xe3d   :  { %v1535_v50 = vmul.f32 1.442695, %v1521_v41  ;;  %v1522_v44 = vsub.f32 %v1490_v21, %v1514_v42 }
 0xe3e   :  { %v1584_v45 = vpop.permute.xlu1 %1583 }
 0xe3f   :  { %2781 = vpow2.f32 %v1535_v50  ;;  %v1537_v52 = vmul.f32 1.442695, %v1522_v44  ;;  %2582 = vmatpush3.bf16.msra.mxu0 %v1584_v45 }
 0xe40   :  { %2783 = vpow2.f32 %v1527_v47  ;;  %2593 = vmatprep.subr.bf16.mxu0 %v2860_v63  ;;  %v2716_v47 = vld [vmem:[%s3618_s7 + $0x18] sm:$0xff]   ;;  %s3659_s7 = smov 24  }
 0xe41   :  { %2785 = vpow2.f32 %v1537_v52 }
 0xe42   :  { %2787 = vpow2.f32 %v1529_v46 }
 0xe43   :  { %2789 = vpow2.f32 %v1531_v56 }
 0xe44   :  { %2791 = vpow2.f32 %v1533_v57 }
 0xe49   :  { %v3456_v58 = vpop.eup %2781 }
 0xe4a   :  { %v2784_v59 = vpop.eup %2783  ;;  %v1557_v60 = vsel %vm528_vm10, %v3456_v58, 0.0 }
 0xe4b   :  { %v2786_v62 = vpop.eup %2785  ;;  %1558 = vadd.xlane.f32.xlu1 %v1557_v60  ;;  %v1545_v1 = vsel %vm528_vm10, %v2784_v59, 0.0 }
 0xe4c   :  { %v1560_v32 = vsel %vm528_vm10, %v2786_v62, 0.0  ;;  %v2788_v0 = vpop.eup %2787 }
 0xe4d   :  { %1561 = vadd.xlane.f32.xlu0 %v1560_v32  ;;  %v2790_v35 = vpop.eup %2789  ;;  %v1548_v2 = vsel %vm528_vm10, %v2788_v0, 0.0 }
 0xe4e   :  { %v2792_v3 = vpop.eup %2791  ;;  %v1551_v4 = vsel %vm528_vm10, %v2790_v35, 0.0 }
 0xe4f   :  { %1546 = vadd.xlane.f32.xlu1 %v1545_v1  ;;  %v1554_v5 = vsel %vm528_vm10, %v2792_v3, 0.0 }
 0xe51   :  { %1549 = vadd.xlane.f32.xlu0 %v1548_v2 }
 0xe53   :  { %1552 = vadd.xlane.f32.xlu1 %v1551_v4 }
 0xe55   :  { %1555 = vadd.xlane.f32.xlu0 %v1554_v5 }
 0xe64   :  { %1677 = vrot.lane.b32.xlu1 %v3390_v30, %s2871_s0 }
 0xe68   :  { %1724 = vrot.lane.b32.xlu1 %v3390_v30, %s2872_s2  ;;  %s3662_s2 = sld [smem:[#allocation17_spill]] }
 0xe6b   :  { %1630 = vrot.lane.b32.xlu0 %v3390_v30, %s2873_s24  ;;  %s2877_s24 = smov [#allocation6]  }
 0xec4   :  { %v1541_v6 = vpop.xlane.xlu1 %1540 }
 0xec5   :  { %2793 = vrcp.f32 %v1541_v6 }
 0xec6   :  { %v1544_v7 = vpop.xlane.xlu0 %1543 }
 0xec7   :  { %2795 = vrcp.f32 %v1544_v7 }
 0xecf   :  { %v2794_v8 = vpop.eup %2793 }
 0xed0   :  { %v1571_v10 = vmul.f32 %v2794_v8, %v2778_v29 }
 0xed1   :  { %v2796_v9 = vpop.eup %2795 }
 0xed2   :  { %v1572_v11 = vmul.f32 %v2796_v9, %v2780_v34 }
 0xed4   :  { %v1579_v12 = vpack.c.bf16 %v1572_v11, %v1571_v10 }
 0xed6   :  { %2584 = vmatmul.mubr.msk.bf16.vlgmr.msra.gmra.mrb[36].mxu0 %vm528_vm10, %v1579_v12 }
 0xed7   :  { %2595 = vmatprep.mubr.msk.bf16.mxu0 %vm2861_vm2, %v2860_v63 }
 0xed8   :  { %v1559_v13 = vpop.xlane.xlu1 %1558 }
 0xeda   :  { %v1562_v14 = vpop.xlane.xlu0 %1561 }
 0xedc   :  { %v1547_v15 = vpop.xlane.xlu1 %1546 }
 0xedd   :  { %2797 = vrcp.f32 %v1547_v15 }
 0xede   :  { %v1550_v16 = vpop.xlane.xlu0 %1549 }
 0xedf   :  { %2799 = vrcp.f32 %v1550_v16 }
 0xee0   :  { %v1553_v30 = vpop.xlane.xlu1 %1552 }
 0xee1   :  { %2801 = vrcp.f32 %v1553_v30 }
 0xee2   :  { %2803 = vrcp.f32 %v1562_v14  ;;  %v1556_v17 = vpop.xlane.xlu0 %1555 }
 0xee3   :  { %2805 = vrcp.f32 %v1556_v17 }
 0xee4   :  { %v1678_v18 = vpop.permute.xlu1 %1677  ;;  %2807 = vrcp.f32 %v1559_v13  ;;  %v2338_v13 = vld [vmem:[%s3619_s8 + $0x1] ss:$0 sm:$0xff]  ;;  %s3660_s8 = sld [smem:[#allocation18_spill]] }
 0xee5   :  { %2594 = vmatpush3.bf16.msra.mxu0 %v1678_v18 }
 0xee6   :  { %v1631_v19 = vpop.permute.xlu0 %1630  ;;  %2605 = vmatprep.subr.bf16.mxu0 %v2860_v63 }
 0xee7   :  { %v2798_v20 = vpop.eup %2797  ;;  %2588 = vmatpush3.bf16.msra.mxu1 %v1631_v19 }
 0xee8   :  { %2599 = vmatprep.subr.bf16.mxu1 %v2860_v63  ;;  %v1573_v21 = vmul.f32 %v2798_v20, %v2784_v59  ;;  %v1725_v28 = vpop.permute.xlu1 %1724 }
 0xee9   :  { %v2800_v48 = vpop.eup %2799 }
 0xeea   :  { %v1574_v22 = vmul.f32 %v2800_v48, %v2788_v0 }
 0xeeb   :  { %v2802_v53 = vpop.eup %2801 }
 0xeec   :  { %v2804_v23 = vpop.eup %2803  ;;  %v1580_v24 = vpack.c.bf16 %v1574_v22, %v1573_v21  ;;  %v1575_v27 = vmul.f32 %v2802_v53, %v2790_v35 }
 0xeed   :  { %v2806_v26 = vpop.eup %2805  ;;  %v1578_v61 = vmul.f32 %v2804_v23, %v2786_v62 }
 0xeee   :  { %v1576_v54 = vmul.f32 %v2806_v26, %v2792_v3  ;;  %2590 = vmatmul.mubr.msk.bf16.vlgmr.msra.gmra.mrb[32].mxu1 %vm528_vm10, %v1580_v24  ;;  %v2808_v25 = vpop.eup %2807 }
 0xeef   :  { %2600 = vmatpush3.bf16.msra.mxu1 %v1725_v28  ;;  %2601 = vmatprep.mubr.msk.bf16.mxu1 %vm2861_vm2, %v2860_v63  ;;  %v1577_v31 = vmul.f32 %v2808_v25, %v3456_v58  ;;  %v2717_v25 = vld [vmem:[%s3622_s11 + $0x10] sm:$0xff]  }
 0xef0   :  { %v1581_v29 = vpack.c.bf16 %v1576_v54, %v1575_v27  ;;  %2613 = vmatprep.subr.bf16.mxu1 %v2860_v63 }
 0xef1   :  { %v1582_v33 = vpack.c.bf16 %v1578_v61, %v1577_v31  ;;  %v2718_v61 = vld [vmem:[%s3622_s11 + $0x18] sm:$0xff]  }
 0xef2   :  { %2596 = vmatmul.mubr.msk.bf16.vlgmr.msra.gmra.mrb[40].mxu0 %vm528_vm10, %v1581_v29 }
 0xef3   :  { %2609 = vmatprep.mubr.msk.bf16.mxu0 %vm2861_vm2, %v2860_v63  ;;  %2606 = vmatpush3.bf16.msra.mxu0 %v2715_v39 }
 0xef4   :  { %2607 = vmatprep.subr.bf16.mxu0 %v2860_v63 }
 0xef6   :  { %2602 = vmatmul.mubr.msk.bf16.vlgmr.msra.gmra.mrb[36].mxu1 %vm528_vm10, %v1582_v33 }
 0xef7   :  { %2617 = vmatprep.mubr.msk.bf16.mxu1 %vm2861_vm2, %v2860_v63  ;;  %2608 = vmatpush3.bf16.msra.mxu0 %v2716_v47 }
 0xef8   :  { %2621 = vmatprep.subr.bf16.mxu0 %v2860_v63  ;;  %2614 = vmatpush3.bf16.msra.mxu1 %v2717_v25 }
 0xef9   :  { %2615 = vmatprep.subr.bf16.mxu1 %v2860_v63 }
 0xefc   :  { %2616 = vmatpush3.bf16.msra.mxu1 %v2718_v61 }
 0xefd   :  { %2641 = vmatprep.subr.bf16.mxu1 %v2860_v63 }
 0xfa9   :  { %v1623_v34 = vpop.f32.mrb[36].mxu0 }
 0xfaa   :  { %v2585_v36 = vpop.f32.mrb[37].mxu0 }
 0xfab   :  { %v1626_v37 = vpop.f32.mrb[38].mxu0 }
 0xfac   :  { %v2586_v38 = vpop.f32.mrb[39].mxu0 }
 0xfc1   :  { %v1670_v40 = vpop.f32.mrb[32].mxu1 }
 0xfc2   :  { %v2591_v41 = vpop.f32.mrb[33].mxu1 }
 0xfc3   :  { %v1673_v42 = vpop.f32.mrb[34].mxu1 }
 0xfc4   :  { %v2684_v43 = vpack.i.bf16 %v1673_v42, %v1670_v40  ;;  %v2592_v50 = vpop.f32.mrb[35].mxu1  ;;  %v2344_v40 = vld [vmem:[%s3620_s9 + $0x1] ss:$0 sm:$0xff]  ;;  %s2236_s9 = sshll.u32 %s2877_s24, 4  ;;  %s2237_s9 = int_to_ptr.vmem [resolvable:$true] %s2236_s9 }
 0xfc5   :  { %v1717_v44 = vpop.f32.mrb[40].mxu0  ;;  %p2838_p6 = scmp.lt.s32.totalorder %s2237_s9, %s2237_s9 }
 0xfc6   :  { %v2597_v45 = vpop.f32.mrb[41].mxu0  ;;  %2685 = vrot.lane.b32.xlu1 %v2684_v43, %s2874_s25  ;;  %v2345_v43 = vld [vmem:[%s3655_s1 + $0x1] ss:$0 sm:$0xff] }
 0xfc7   :  { %v1720_v46 = vpop.f32.mrb[42].mxu0 }
 0xfc8   :  { %v2689_v51 = vpack.i.bf16 %v1720_v46, %v1717_v44  ;;  %v2598_v52 = vpop.f32.mrb[43].mxu0 }
 0xfc9   :  { %v1764_v56 = vpop.f32.mrb[36].mxu1  ;;  %v2720_v52 = vld [vmem:[%s3656_s14 + $0x48] sm:$0xff]  }
 0xfca   :  { %2690 = vrot.lane.b32.xlu0 %v2689_v51, %s2875_s15  ;;  %v2603_v57 = vpop.f32.mrb[37].mxu1  ;;  %v2719_v51 = vld [vmem:[%s3656_s14 + $0x40] sm:$0xff]   ;;  %s2833_s15 = scalar_lea.vmem %s2237_s9, 256 }
 0xfcb   :  { %v1767_v58 = vpop.f32.mrb[38].mxu1  ;;  %v2722_v57 = vld [vmem:[%s3656_s14 + $0x58] sm:$0xff]   ;;  %p2834_p5 = scmp.ne.s32.totalorder %s2237_s9, %s2833_s15  ;;  %p2839_p7 = scmp.lt.s32.totalorder %s2833_s15, %s2833_s15 }
 0xfcc   :  { %v2694_v59 = vpack.i.bf16 %v1767_v58, %v1764_v56  ;;  %v2604_v60 = vpop.f32.mrb[39].mxu1  ;;  %v2721_v56 = vld [vmem:[%s3656_s14 + $0x50] sm:$0xff]   ;;  %v2723_v58 = vld [vmem:[%s3656_s14 + $0x60] sm:$0xff]  }
 0xfcd   :  { %v2725_v60 = vld [vmem:[%s3656_s14 + $0x70] sm:$0xff]   ;;  %p2840_p8 = por %p2839_p7, %p2838_p6 }
 0xfce   :  { %2695 = vrot.lane.b32.xlu1 %v2694_v59, %s3659_s7  ;;  %v2724_v59 = vld [vmem:[%s3656_s14 + $0x68] sm:$0xff]  }
 0xfcf   :  { %p2841_p9 = pnand %p2840_p8, %p2834_p5 }
0x1038   :  { %v2686_v62 = vpop.permute.xlu1 %2685 }
0x1039   :  { %v2688_v0 = vunpack.i.h.bf16 %v2686_v62  ;;  %v2687_v1 = vunpack.i.l.bf16 %v2686_v62  ;;  %v2726_v62 = vld [vmem:[%s3656_s14 + $0x78] sm:$0xff]  }
0x103b   :  { %v1796_v4 = vsel %vm311_vm3, %v1626_v37, %v2688_v0  ;;  %v1795_v5 = vsel %vm311_vm3, %v1623_v34, %v2687_v1 }
0x103c   :  { %v2691_v32 = vpop.permute.xlu0 %2690 }
0x103d   :  { %v2693_v35 = vunpack.i.h.bf16 %v2691_v32  ;;  %v2692_v2 = vunpack.i.l.bf16 %v2691_v32  ;;  %v2351_v32 = vld [vmem:[%s3657_s23 + $0x1] ss:$0 sm:$0xff] }
0x103f   :  { %v1797_v8 = vsel %vm528_vm10, %v1795_v5, %v2692_v2  ;;  %v1798_v9 = vsel %vm528_vm10, %v1796_v4, %v2693_v35 }
0x1040   :  { %v2696_v3 = vpop.permute.xlu1 %2695 }
0x1041   :  { %v2698_v6 = vunpack.i.h.bf16 %v2696_v3  ;;  %v2697_v7 = vunpack.i.l.bf16 %v2696_v3 }
0x1043   :  { %v1800_v10 = vsel %vm837_vm11, %v1798_v9, %v2698_v6  ;;  %v1799_v11 = vsel %vm837_vm11, %v1797_v8, %v2697_v7 }
0x1044   :  { %v1801_v12 = vpack.c.bf16 %v1800_v10, %v1799_v11 }
0x1046   :  { %2610 = vmatmul.mubr.msk.bf16.vlgmr.msra.gmra.mrb[44].mxu0 %vm195_vm1, %v1801_v12 }
0x1047   :  { %2637 = vmatprep.mubr.msk.bf16.mxu0 %vm2861_vm2, %v2860_v63  ;;  %2622 = vmatpush3.bf16.msra.mxu0 %v2719_v51 }
0x1048   :  { %2623 = vmatprep.subr.bf16.mxu0 %v2860_v63 }
0x104b   :  { %2624 = vmatpush3.bf16.msra.mxu0 %v2720_v52  ;;  %v2381_v52 = vld [vmem:[%s3661_s21] ss:$0 sm:$0xff] }
0x104c   :  { %2625 = vmatprep.subr.bf16.mxu0 %v2860_v63 }
0x104f   :  { %2626 = vmatpush3.bf16.msra.mxu0 %v2721_v56 }
0x1050   :  { %2627 = vmatprep.subr.bf16.mxu0 %v2860_v63 }
0x1053   :  { %2628 = vmatpush3.bf16.msra.mxu0 %v2722_v57 }
0x1054   :  { %2629 = vmatprep.subr.bf16.mxu0 %v2860_v63 }
0x1057   :  { %2630 = vmatpush3.bf16.msra.mxu0 %v2723_v58 }
0x1058   :  { %2631 = vmatprep.subr.bf16.mxu0 %v2860_v63 }
0x105b   :  { %2632 = vmatpush3.bf16.msra.mxu0 %v2724_v59 }
0x105c   :  { %2633 = vmatprep.subr.bf16.mxu0 %v2860_v63 }
0x105f   :  { %2634 = vmatpush3.bf16.msra.mxu0 %v2725_v60 }
0x1060   :  { %2635 = vmatprep.subr.bf16.mxu0 %v2860_v63 }
0x1063   :  { %2636 = vmatpush3.bf16.msra.mxu0 %v2726_v62 }
0x1119   :  { %v1864_v14 = vpop.f32.mrb[44].mxu0 }
0x111a   :  { %v1865_v15 = vadd.f32 %v2338_v13, %v1864_v14  ;;  %v2611_v16 = vpop.f32.mrb[45].mxu0 }
0x111b   :  { %v1867_v30 = vpop.f32.mrb[46].mxu0 }
0x111c   :  { %v3511_v17 = vadd.f32 %v1865_v15, %v3357_v49  ;;  %v1868_v18 = vadd.f32 %v2338_v13, %v1867_v30  ;;  %v2612_v19 = vpop.f32.mrb[47].mxu0 }
0x111e   :  { %v3514_v20 = vadd.f32 %v1868_v18, %v3360_v55  ;;  %v1877_v48 = vsel %vm195_vm1, %v3511_v17, 0.0 }
0x111f   :  { %1878 = vadd.xlane.f32.xlu0 %v1877_v48 }
0x1120   :  { %v1880_v21 = vsel %vm195_vm1, %v3514_v20, 0.0 }
0x1121   :  { %1881 = vadd.xlane.f32.xlu1 %v1880_v21 }
0x11ac   :  { %v1879_v22 = vpop.xlane.xlu0 %1878 }
0x11ad   :  { %v1883_v53 = vmul.f32 0.03125, %v1879_v22 }
0x11ae   :  { %v1882_v23 = vpop.xlane.xlu1 %1881 }
0x11af   :  { %v1885_v24 = vsub.f32 %v3511_v17, %v1883_v53  ;;  %v1884_v49 = vmul.f32 0.03125, %v1882_v23  ;;  %v2372_v23 = vld [vmem:[%s3658_s18 + $0x1] ss:$0 sm:$0xff] }
0x11b1   :  { %v1886_v26 = vsub.f32 %v3514_v20, %v1884_v49  ;;  %v1887_v27 = vmul.f32 %v1885_v24, %v1885_v24 }
0x11b3   :  { %v1889_v55 = vsel %vm195_vm1, %v1887_v27, 0.0  ;;  %v1888_v54 = vmul.f32 %v1886_v26, %v1886_v26 }
0x11b4   :  { %1890 = vadd.xlane.f32.xlu0 %v1889_v55 }
0x11b5   :  { %v1892_v28 = vsel %vm195_vm1, %v1888_v54, 0.0 }
0x11b8   :  { %1893 = vadd.xlane.f32.xlu0 %v1892_v28 }
0x1241   :  { %v1891_v29 = vpop.xlane.xlu0 %1890 }
0x1242   :  { %v1895_v31 = vmul.f32 0.03125, %v1891_v29 }
0x1244   :  { %v1897_v33 = vadd.f32 1e-05, %v1895_v31 }
0x1245   :  { %v1894_v34 = vpop.xlane.xlu0 %1893 }
0x1246   :  { %2809 = vrsqrt.f32 %v1897_v33  ;;  %v1896_v36 = vmul.f32 0.03125, %v1894_v34 }
0x1248   :  { %v1898_v37 = vadd.f32 1e-05, %v1896_v36 }
0x124a   :  { %2811 = vrsqrt.f32 %v1898_v37 }
0x1250   :  { %v2810_v38 = vpop.eup %2809 }
0x1251   :  { %v1901_v39 = vmul.f32 %v2810_v38, %v1885_v24 }
0x1253   :  { %v1909_v47 = vmul.f32 %v2344_v40, %v1901_v39 }
0x1254   :  { %v2812_v41 = vpop.eup %2811 }
0x1255   :  { %v1902_v42 = vmul.f32 %v2812_v41, %v1886_v26  ;;  %v1917_v44 = vadd.f32 %v2345_v43, %v1909_v47  ;;  %v2728_v47 = vld [vmem:[%s3660_s8 + $0x8] sm:$0xff]  }
0x1257   :  { %v1910_v50 = vmul.f32 %v2344_v40, %v1902_v42 }
0x1259   :  { %v1918_v45 = vadd.f32 %v2345_v43, %v1910_v50 }
0x125b   :  { %v1919_v46 = vpack.c.bf16 %v1918_v45, %v1917_v44 }
0x125d   :  { %2618 = vmatmul.mubr.msk.bf16.vlgmr.msra.gmra.mrb[40].mxu1 %vm195_vm1, %v1919_v46 }
0x125e   :  { %2645 = vmatprep.mubr.msk.bf16.mxu1 %vm2861_vm2, %v2860_v63 }
0x1330   :  { %v1982_v0 = vpop.f32.mrb[40].mxu1 }
0x1331   :  { %v1983_v1 = vadd.f32 %v2351_v32, %v1982_v0  ;;  %v2619_v35 = vpop.f32.mrb[41].mxu1 }
0x1332   :  { %v1985_v2 = vpop.f32.mrb[42].mxu1 }
0x1333   :  { %v1991_v3 = vmul.f32 0.044715, %v1983_v1  ;;  %v1986_v4 = vadd.f32 %v2351_v32, %v1985_v2  ;;  %v2620_v5 = vpop.f32.mrb[43].mxu1  ;;  %v1989_v18 = vmul.f32 0.5, %v1983_v1 }
0x1335   :  { %v1993_v6 = vmul.f32 %v1991_v3, %v1983_v1  ;;  %v1992_v7 = vmul.f32 0.044715, %v1986_v4  ;;  %v1990_v19 = vmul.f32 0.5, %v1986_v4 }
0x1337   :  { %v1995_v8 = vmul.f32 %v1993_v6, %v1983_v1  ;;  %v1994_v9 = vmul.f32 %v1992_v7, %v1986_v4 }
0x1339   :  { %v1997_v10 = vadd.f32 %v1995_v8, %v1983_v1  ;;  %v1996_v11 = vmul.f32 %v1994_v9, %v1986_v4 }
0x133b   :  { %v1999_v12 = vmul.f32 0.7978846, %v1997_v10  ;;  %v1998_v13 = vadd.f32 %v1996_v11, %v1986_v4 }
0x133d   :  { %2813 = vtanh.f32 %v1999_v12  ;;  %v2000_v14 = vmul.f32 0.7978846, %v1998_v13 }
0x133f   :  { %2815 = vtanh.f32 %v2000_v14 }
0x1347   :  { %v2814_v15 = vpop.eup %2813 }
0x1348   :  { %v2003_v16 = vadd.f32 1.0, %v2814_v15 }
0x1349   :  { %v2816_v30 = vpop.eup %2815 }
0x134a   :  { %v2004_v48 = vadd.f32 1.0, %v2816_v30  ;;  %v2005_v21 = vmul.f32 %v2003_v16, %v1989_v18 }
0x134c   :  { %v2006_v22 = vmul.f32 %v2004_v48, %v1990_v19 }
0x134e   :  { %v2007_v53 = vpack.c.bf16 %v2006_v22, %v2005_v21 }
0x1350   :  { %2638 = vmatmul.mubr.bf16.vlgmr.msra.gmra.mrb[48].mxu0 %v2007_v53 }
0x1423   :  { %v2115_v24 = vpop.f32.mrb[48].mxu0 }
0x1424   :  { %v2116_v49 = vadd.f32 %v2372_v23, %v2115_v24  ;;  %v2639_v26 = vpop.f32.mrb[49].mxu0 }
0x1425   :  { %v2118_v27 = vpop.f32.mrb[50].mxu0 }
0x1426   :  { %v2119_v55 = vadd.f32 %v2372_v23, %v2118_v27  ;;  %v2640_v54 = vpop.f32.mrb[51].mxu0  ;;  %v2122_v28 = vadd.f32 %v2116_v49, %v3511_v17 }
0x1428   :  { %v2126_v25 = vsel %vm195_vm1, %v2122_v28, 0.0  ;;  %v2123_v61 = vadd.f32 %v2119_v55, %v3514_v20  ;;  %v2727_v20 = vld [vmem:[%s3660_s8] sm:$0xff]  }
0x1429   :  { %2127 = vadd.xlane.f32.xlu0 %v2126_v25  ;;  %2642 = vmatpush3.bf16.msra.mxu1 %v2727_v20 }
0x142a   :  { %v2129_v29 = vsel %vm195_vm1, %v2123_v61, 0.0  ;;  %2643 = vmatprep.subr.bf16.mxu1 %v2860_v63  ;;  %v2382_v63 = vld [vmem:[%s3662_s2] ss:$0 sm:$0xff] }
0x142b   :  { %2130 = vadd.xlane.f32.xlu1 %v2129_v29 }
0x142d   :  { %2644 = vmatpush3.bf16.msra.mxu1 %v2728_v47 }
0x14b6   :  { %v2128_v31 = vpop.xlane.xlu0 %2127 }
0x14b7   :  { %v2132_v33 = vmul.f32 0.03125, %v2128_v31 }
0x14b8   :  { %v2131_v34 = vpop.xlane.xlu1 %2130 }
0x14b9   :  { %v2134_v36 = vsub.f32 %v2122_v28, %v2132_v33  ;;  %v2133_v37 = vmul.f32 0.03125, %v2131_v34 }
0x14bb   :  { %v2135_v38 = vsub.f32 %v2123_v61, %v2133_v37  ;;  %v2136_v39 = vmul.f32 %v2134_v36, %v2134_v36 }
0x14bd   :  { %v2138_v40 = vsel %vm195_vm1, %v2136_v39, 0.0  ;;  %v2137_v41 = vmul.f32 %v2135_v38, %v2135_v38 }
0x14be   :  { %2139 = vadd.xlane.f32.xlu0 %v2138_v40 }
0x14bf   :  { %v2141_v17 = vsel %vm195_vm1, %v2137_v41, 0.0 }
0x14c0   :  { %2142 = vadd.xlane.f32.xlu1 %v2141_v17 }
0x154b   :  { %v2140_v42 = vpop.xlane.xlu0 %2139 }
0x154c   :  { %v2144_v43 = vmul.f32 0.03125, %v2140_v42 }
0x154d   :  { %v2143_v50 = vpop.xlane.xlu1 %2142 }
0x154e   :  { %v2146_v44 = vadd.f32 1e-05, %v2144_v43  ;;  %v2145_v45 = vmul.f32 0.03125, %v2143_v50 }
0x1550   :  { %2817 = vrsqrt.f32 %v2146_v44  ;;  %v2147_v46 = vadd.f32 1e-05, %v2145_v45 }
0x1552   :  { %2819 = vrsqrt.f32 %v2147_v46 }
0x155a   :  { %v2818_v51 = vpop.eup %2817 }
0x155b   :  { %v2150_v56 = vmul.f32 %v2818_v51, %v2134_v36 }
0x155c   :  { %v2820_v57 = vpop.eup %2819 }
0x155d   :  { %v2158_v58 = vmul.f32 %v2381_v52, %v2150_v56  ;;  %v2151_v59 = vmul.f32 %v2820_v57, %v2135_v38 }
0x155f   :  { %v2159_v60 = vmul.f32 %v2381_v52, %v2151_v59  ;;  %v2166_v62 = vadd.f32 %v2382_v63, %v2158_v58 }
0x1561   :  { %v2167_v32 = vadd.f32 %v2382_v63, %v2159_v60 }
0x1563   :  { %v2168_v0 = vpack.c.bf16 %v2167_v32, %v2166_v62 }
0x1565   :  { %2646 = vmatmul.mubr.msk.bf16.vlgmr.msra.gmra.mrb[44].mxu1 %vm195_vm1, %v2168_v0 }
0x1638   :  { %v2222_v1 = vpop.f32.mrb[44].mxu1 }
0x1639   :  { %2229 = vst [vmem:[#allocation6] sm:$0xff] %v2222_v1  ;;  %v2647_v35 = vpop.f32.mrb[45].mxu1 }
0x163a   :  { %v2225_v2 = vpop.f32.mrb[46].mxu1 }
0x163b   :  { %2230 = vst [vmem:[#allocation6 + $0x8] sm:$0xff] %v2225_v2  ;;  %v2648_v3 = vpop.f32.mrb[47].mxu1 }
0x163c   :  { %2844 = shalt.err (!%p2841_p9)
}
0x163d   :  { %s3663_s29 = sld [smem:[#allocation19_spill]] }
0x1643   :  { %s2845_s16 = scalar_lea.hbm %s3663_s29, 256 }
0x1644   :  { %p2846_p10 = scmp.ne.s32.totalorder %s3663_s29, %s2845_s16  ;;  %p2849_p11 = scmp.lt.u32.totalorder %s2845_s16, %s3663_s29 }
0x1646   :  { %p2851_p12 = pnand %p2849_p11, %p2846_p10 }
0x1648   :  { %2854 = shalt.err (!%p2851_p12)
}
0x1649   :  { %s2878_s3 = smov 128  }
0x164a   :  { %2242 = dma.vmem_to_hbm [thread:$0]  %s2237_s9, 256, %s3663_s29, [#allocation4], %s2878_s3, %s2878_s3, %s2874_s25  }
0x164b   :  { %2857 = dma.done.wait [#allocation4], 256  }
0x164c   :  { %2858 = vsyncadd [#allocation4], 4294967040 }
0x164d   :  { %2246 = vsyncpa [#allocation4], 1 }
0x164e   :  { %2247 = vsyncpa [#allocation5], 1 }

</bundles_post_ra>
